<compile_context>
chip_gen: v5e
topology: v5e:2x2
jax: 0.10.0
libtpu: 0.0.40
codegen_flags: <defaults>
</compile_context>

<pallas_src>
import jax
import jax.numpy as jnp
from jax.experimental import pallas as pl
from jax.experimental.pallas import tpu as pltpu


def _round_up(x, m):
    return ((x + m - 1) // m) * m


def _final_pose_kernel(x_ref, w1_ref, b1_ref, wh_ref, bh_ref, out_ref):
    # x_ref: (tm, F) tile of the flattened input rows.
    x = x_ref[...].astype(jnp.float32)

    # Hidden MLP + ReLU (MXU matmul, f32 accumulation).
    h = jnp.dot(x, w1_ref[...], preferred_element_type=jnp.float32)
    h = jnp.maximum(h + b1_ref[...], 0.0)                      # (tm, 128)

    # Fused head: columns [0:3]=trans, [3:7]=quat, [7]=pad.  Bias already
    # holds b_trans, b_quat + identity quaternion (folded in the wrapper).
    y = jnp.dot(h, wh_ref[...], preferred_element_type=jnp.float32)
    y = y + bh_ref[...]                                        # (tm, 8)

    col = jax.lax.broadcasted_iota(jnp.int32, y.shape, 1)
    is_trans = col < 3
    is_quat = jnp.logical_and(col >= 3, col < 7)

    t = jnp.tanh(y)                                            # EUP
    q_sq = jnp.where(is_quat, y * y, 0.0)
    inv_norm = jax.lax.rsqrt(1e-12 + jnp.sum(q_sq, axis=-1, keepdims=True))
    out = jnp.where(is_trans, t, jnp.where(is_quat, y * inv_norm, 0.0))

    # Lane-dense store: (8, tm) with tm a multiple of 128 (transpose rides
    # the otherwise-idle XLU slot).
    out_ref[...] = out.T.astype(out_ref.dtype)


def _fuse_params(params):
    """Fuse trans/quat heads into one (128, 8) weight and (1, 8) bias."""
    w1, b1, wt, bt, wq, bq = params
    f32 = jnp.float32
    wh = jnp.concatenate(
        [wt.astype(f32), wq.astype(f32), jnp.zeros((wt.shape[0], 1), f32)],
        axis=1)                                               # (128, 8)
    identity_quat = jnp.array([1.0, 0.0, 0.0, 0.0], f32)
    bh = jnp.concatenate(
        [bt.reshape(-1).astype(f32),
         bq.reshape(-1).astype(f32) + identity_quat,
         jnp.zeros((1,), f32)]).reshape(1, 8)                  # (1, 8)
    return w1.astype(f32), b1.reshape(1, -1).astype(f32), wh, bh


def final_pose_head(feat, params, *, tm=512):
    """feat: (B, N, feat_dim) float32 -> (B, N, 7)."""
    B, N, F = feat.shape
    M = B * N
    w1, b1, wh, bh = _fuse_params(params)

    # Row tile: large enough to amortize per-step pipeline overhead, multiple
    # of 128 so the (8, tm) output block is lane-dense; tiny problems collapse
    # to a single grid step.
    tm = min(tm, _round_up(M, 128))
    m_pad = _round_up(M, tm)

    x = feat.reshape(M, F)
    if m_pad != M:
        x = jnp.pad(x, ((0, m_pad - M), (0, 0)))

    out_t = pl.pallas_call(
        _final_pose_kernel,
        out_shape=jax.ShapeDtypeStruct((8, m_pad), feat.dtype),
        grid_spec=pltpu.PrefetchScalarGridSpec(
            num_scalar_prefetch=0,
            grid=(m_pad // tm,),
            in_specs=[
                pl.BlockSpec((tm, F), lambda i: (i, 0)),      # x rows
                pl.BlockSpec((F, 128), lambda i: (0, 0)),     # W1
                pl.BlockSpec((1, 128), lambda i: (0, 0)),     # b1
                pl.BlockSpec((128, 8), lambda i: (0, 0)),     # W_head (fused)
                pl.BlockSpec((1, 8), lambda i: (0, 0)),       # b_head (fused)
            ],
            out_specs=pl.BlockSpec((8, tm), lambda i: (0, i)),
        ),
        compiler_params=pltpu.CompilerParams(
            dimension_semantics=("parallel",),
            vmem_limit_bytes=64 * 1024 * 1024),
    )(x, w1, b1, wh, bh)

    # (8, M_pad) -> (M, 7) -> (B, N, 7)
    return out_t.T[:M, :7].reshape(B, N, 7)


def init_params(key, feat_dim):
    """Deterministic init mimicking nn.Linear defaults (uniform +-1/sqrt(fan_in));
    quat bias is zeroed as in the module's __init__."""
    k1, k2, k3, k4, k5 = jax.random.split(key, 5)
    lim1 = 1.0 / jnp.sqrt(feat_dim)
    lim2 = 1.0 / jnp.sqrt(128.0)
    w1 = jax.random.uniform(k1, (feat_dim, 128), jnp.float32, -lim1, lim1)
    b1 = jax.random.uniform(k2, (1, 128), jnp.float32, -lim1, lim1)
    wt = jax.random.uniform(k3, (128, 3), jnp.float32, -lim2, lim2)
    bt = jax.random.uniform(k4, (1, 3), jnp.float32, -lim2, lim2)
    wq = jax.random.uniform(k5, (128, 4), jnp.float32, -lim2, lim2)
    bq = jnp.zeros((1, 4), jnp.float32)       # self.quat.bias.data.zero_()
    return (w1, b1, wt, bt, wq, bq)


def _reference(feat, params):
    """Pure-JAX reference matching the PyTorch forward exactly."""
    w1, b1, wt, bt, wq, bq = params
    h = jax.nn.relu(feat @ w1 + b1.reshape(-1))
    t = jnp.tanh(h @ wt + bt.reshape(-1))
    q = h @ wq + bq.reshape(-1) + jnp.array([1.0, 0.0, 0.0, 0.0], jnp.float32)
    q = q / jnp.sqrt(1e-12 + jnp.sum(q**2, axis=-1, keepdims=True))
    return jnp.concatenate([t, q], axis=-1)


if __name__ == "__main__":
    # Keep kernel and reference matmuls at full f32 precision so the 1e-5
    # tolerance is meaningful on every TPU generation.
    jax.config.update("jax_default_matmul_precision", "float32")

    key = jax.random.PRNGKey(0)
    k_feat, k_param = jax.random.split(key)

    B, N, FEAT_DIM = 2, 8, 32          # small shapes: batch=2, seq=8, feat_dim=32
    feat = jax.random.normal(k_feat, (B, N, FEAT_DIM), dtype=jnp.float32)
    params = init_params(k_param, FEAT_DIM)

    out = final_pose_head(feat, params)
    out = jax.block_until_ready(out)

    ref = _reference(feat, params)
    assert out.shape == (B, N, 7)
    assert jnp.allclose(out, ref, atol=1e-5, rtol=1e-5), (
        float(jnp.max(jnp.abs(out - ref))))

    print("KERNEL_OK")
</pallas_src>

<mosaic_0001>
module attributes {stable_mosaic.version = 11 : i64} {
  func.func @_final_pose_kernel(%arg0: i32, %arg1: memref<128x32xf32, #tpu.memory_space<vmem>>, %arg2: memref<32x128xf32, #tpu.memory_space<vmem>>, %arg3: memref<1x128xf32, #tpu.memory_space<vmem>>, %arg4: memref<128x8xf32, #tpu.memory_space<vmem>>, %arg5: memref<1x8xf32, #tpu.memory_space<vmem>>, %arg6: memref<8x128xf32, #tpu.memory_space<vmem>>) attributes {dimension_semantics = [#tpu.dimension_semantics<parallel>], iteration_bounds = array<i64: 1>, scalar_prefetch = 0 : i64, scratch_operands = 0 : i64, tpu.core_type = #tpu.core_type<tc>, window_params = [{transform_indices = @transform_0, window_bounds = array<i64: 128, 32>}, {pipeline_mode = #tpu.pipeline_mode<synchronous>, transform_indices = @transform_1, window_bounds = array<i64: 32, 128>}, {pipeline_mode = #tpu.pipeline_mode<synchronous>, transform_indices = @transform_2, window_bounds = array<i64: 1, 128>}, {pipeline_mode = #tpu.pipeline_mode<synchronous>, transform_indices = @transform_3, window_bounds = array<i64: 128, 8>}, {pipeline_mode = #tpu.pipeline_mode<synchronous>, transform_indices = @transform_4, window_bounds = array<i64: 1, 8>}, {transform_indices = @transform_5, window_bounds = array<i64: 8, 128>}]} {
    %c0 = arith.constant 0 : index
    %c0_0 = arith.constant 0 : index
    %0 = vector.load %arg1[%c0, %c0_0] : memref<128x32xf32, #tpu.memory_space<vmem>>, vector<128x32xf32>
    %c0_1 = arith.constant 0 : index
    %c0_2 = arith.constant 0 : index
    %1 = vector.load %arg2[%c0_1, %c0_2] : memref<32x128xf32, #tpu.memory_space<vmem>>, vector<32x128xf32>
    %cst = arith.constant dense<0.000000e+00> : vector<128x128xf32>
    %2 = tpu.matmul %0, %1, %cst {dimension_numbers = #tpu.dot_dimension_numbers<[1], [0], [0], [1], [0, 0, 1, 1], [], []>, precision = #tpu.contract_precision<fp32>} : vector<128x32xf32>, vector<32x128xf32>, vector<128x128xf32> -> vector<128x128xf32>
    %c0_3 = arith.constant 0 : index
    %c0_4 = arith.constant 0 : index
    %3 = vector.load %arg3[%c0_3, %c0_4] : memref<1x128xf32, #tpu.memory_space<vmem>>, vector<1x128xf32>
    %4 = vector.broadcast %3 : vector<1x128xf32> to vector<128x128xf32>
    %5 = arith.addf %2, %4 : vector<128x128xf32>
    %cst_5 = arith.constant 0.000000e+00 : f32
    %6 = vector.broadcast %cst_5 : f32 to vector<128x128xf32>
    %7 = arith.maximumf %5, %6 : vector<128x128xf32>
    %c0_6 = arith.constant 0 : index
    %c0_7 = arith.constant 0 : index
    %8 = vector.load %arg4[%c0_6, %c0_7] : memref<128x8xf32, #tpu.memory_space<vmem>>, vector<128x8xf32>
    %cst_8 = arith.constant dense<0.000000e+00> : vector<128x8xf32>
    %9 = tpu.matmul %7, %8, %cst_8 {dimension_numbers = #tpu.dot_dimension_numbers<[1], [0], [0], [1], [0, 0, 1, 1], [], []>, precision = #tpu.contract_precision<fp32>} : vector<128x128xf32>, vector<128x8xf32>, vector<128x8xf32> -> vector<128x8xf32>
    %c0_9 = arith.constant 0 : index
    %c0_10 = arith.constant 0 : index
    %10 = vector.load %arg5[%c0_9, %c0_10] : memref<1x8xf32, #tpu.memory_space<vmem>>, vector<1x8xf32>
    %11 = vector.broadcast %10 : vector<1x8xf32> to vector<128x8xf32>
    %12 = arith.addf %9, %11 : vector<128x8xf32>
    %13 = tpu.iota {dimensions = array<i32: 1>} : vector<128x8xi32>
    %c3_i32 = arith.constant 3 : i32
    %14 = vector.broadcast %c3_i32 : i32 to vector<128x8xi32>
    %15 = arith.cmpi slt, %13, %14 : vector<128x8xi32>
    %c3_i32_11 = arith.constant 3 : i32
    %16 = vector.broadcast %c3_i32_11 : i32 to vector<128x8xi32>
    %17 = arith.cmpi sge, %13, %16 : vector<128x8xi32>
    %c7_i32 = arith.constant 7 : i32
    %18 = vector.broadcast %c7_i32 : i32 to vector<128x8xi32>
    %19 = arith.cmpi slt, %13, %18 : vector<128x8xi32>
    %20 = arith.andi %17, %19 : vector<128x8xi1>
    %21 = math.tanh %12 : vector<128x8xf32>
    %22 = arith.mulf %12, %12 : vector<128x8xf32>
    %cst_12 = arith.constant 0.000000e+00 : f32
    %23 = vector.broadcast %cst_12 : f32 to vector<128x8xf32>
    %24 = arith.select %20, %22, %23 : vector<128x8xi1>, vector<128x8xf32>
    %cst_13 = arith.constant dense<0.000000e+00> : vector<128xf32>
    %25 = vector.multi_reduction <add>, %24, %cst_13 [1] : vector<128x8xf32> to vector<128xf32>
    %26 = vector.shape_cast %25 : vector<128xf32> to vector<128x1xf32>
    %cst_14 = arith.constant 9.99999996E-13 : f32
    %27 = vector.broadcast %cst_14 : f32 to vector<128x1xf32>
    %28 = arith.addf %27, %26 : vector<128x1xf32>
    %29 = math.rsqrt %28 : vector<128x1xf32>
    %30 = vector.broadcast %29 : vector<128x1xf32> to vector<128x8xf32>
    %31 = arith.mulf %12, %30 : vector<128x8xf32>
    %cst_15 = arith.constant 0.000000e+00 : f32
    %32 = vector.broadcast %cst_15 : f32 to vector<128x8xf32>
    %33 = arith.select %20, %31, %32 : vector<128x8xi1>, vector<128x8xf32>
    %34 = arith.select %15, %21, %33 : vector<128x8xi1>, vector<128x8xf32>
    %35 = tpu.transpose %34, [1, 0] : vector<128x8xf32> -> vector<8x128xf32>
    %c0_16 = arith.constant 0 : index
    %c0_17 = arith.constant 0 : index
    %36 = vector.load %arg6[%c0_16, %c0_17] : memref<8x128xf32, #tpu.memory_space<vmem>>, vector<8x128xf32>
    tpu.vector_store %arg6[%c0_16, %c0_17], %35 {strides = array<i32>} : memref<8x128xf32, #tpu.memory_space<vmem>>, vector<8x128xf32>,
    return
  }
  func.func @transform_0(%arg0: i32) -> (i32, i32) {
    %c0_i32 = arith.constant 0 : i32
    %c0_i32_0 = arith.constant 0 : i32
    return %arg0, %c0_i32 : i32, i32
  }
  func.func @transform_1(%arg0: i32) -> (i32, i32) {
    %c0_i32 = arith.constant 0 : i32
    %c0_i32_0 = arith.constant 0 : i32
    %c0_i32_1 = arith.constant 0 : i32
    return %c0_i32, %c0_i32_0 : i32, i32
  }
  func.func @transform_2(%arg0: i32) -> (i32, i32) {
    %c0_i32 = arith.constant 0 : i32
    %c0_i32_0 = arith.constant 0 : i32
    %c0_i32_1 = arith.constant 0 : i32
    return %c0_i32, %c0_i32_0 : i32, i32
  }
  func.func @transform_3(%arg0: i32) -> (i32, i32) {
    %c0_i32 = arith.constant 0 : i32
    %c0_i32_0 = arith.constant 0 : i32
    %c0_i32_1 = arith.constant 0 : i32
    return %c0_i32, %c0_i32_0 : i32, i32
  }
  func.func @transform_4(%arg0: i32) -> (i32, i32) {
    %c0_i32 = arith.constant 0 : i32
    %c0_i32_0 = arith.constant 0 : i32
    %c0_i32_1 = arith.constant 0 : i32
    return %c0_i32, %c0_i32_0 : i32, i32
  }
  func.func @transform_5(%arg0: i32) -> (i32, i32) {
    %c0_i32 = arith.constant 0 : i32
    %c0_i32_0 = arith.constant 0 : i32
    return %c0_i32, %arg0 : i32, i32
  }
}

</mosaic_0001>

<bundles_post_ra>
// kernel: tpu_custom_call.1
= control target key start
LH: loop header
LB: loop body
LE: loop exit
PB: predicated region body
PF: predicated region fallthrough
CT: control target
= control target key end

     0   :  { %vm45_vm0 = vcmask 261120   ;;  %s3193_s0 = inlined_call_operand.vmem [shape: f32[128,32], index: 0, kind: input, shape index: {}]   ;;  %s3194_s1 = inlined_call_operand.vmem [shape: f32[32,128], index: 1, kind: input, shape index: {}]   ;;  %s3195_s2 = inlined_call_operand.vmem [shape: f32[1,128], index: 2, kind: input, shape index: {}]   ;;  %s3196_s3 = inlined_call_operand.vmem [shape: f32[128,8], index: 3, kind: input, shape index: {}]   ;;  %s3197_s4 = inlined_call_operand.vmem [shape: f32[1,8], index: 4, kind: input, shape index: {}]   ;;  %s3198_s5 = inlined_call_operand.hbm [shape: f32[8,128], index: 5, kind: output, shape index: {}]  }
   0x1   :  { %v40_v0 = vld [vmem:[%s3194_s1 + $0x18] sm:$0xff]  ;;  %v39_v1 = vld [vmem:[%s3194_s1 + $0x10] sm:$0xff]  ;;  %v38_v2 = vld [vmem:[%s3194_s1 + $0x8] sm:$0xff] }
   0x2   :  { %v2095_v3 = vand.u32 4294901760, %v40_v0  ;;  %v2097_v4 = vand.u32 4294901760, %v39_v1  ;;  %v2099_v5 = vand.u32 4294901760, %v38_v2  ;;  %v37_v6 = vld [vmem:[%s3194_s1] sm:$0xff]  ;;  %v22_v8 = vld [vmem:[%s3193_s0 + $0x8] sm:$0xff]  ;;  %v23_v12 = vld [vmem:[%s3193_s0 + $0x10] sm:$0xff] }
   0x3   :  { %v21_v7 = vld [vmem:[%s3193_s0] sm:$0xff]  ;;  %v2110_v9 = vand.u32 4294901760, %v37_v6  ;;  %v50_v11 = vsel %vm45_vm0, %v22_v8, 0  ;;  %v53_v19 = vsel %vm45_vm0, %v23_v12, 0 }
   0x4   :  { %v47_v10 = vsel %vm45_vm0, %v21_v7, 0  ;;  %107 = vmatpush.msra.mxu0 %v2095_v3  ;;  %v256_v13 = vsub.f32 %v40_v0, %v2095_v3  ;;  %v262_v14 = vsub.f32 %v39_v1, %v2097_v4  ;;  %462 = vmatpush.msra.mxu3 %v2095_v3  ;;  %v268_v15 = vsub.f32 %v38_v2, %v2099_v5 }
   0x5   :  { %v2122_v16 = vand.u32 4294901760, %v47_v10  ;;  %v274_v17 = vsub.f32 %v37_v6, %v2110_v9  ;;  %v2125_v18 = vand.u32 4294901760, %v50_v11 }
   0x6   :  { %10 = vsyncpa [#allocation3], 0  ;;  %109 = vmatpush.msra.mxu0 %v2097_v4  ;;  %358 = vmatpush.msra.mxu2 %v256_v13  ;;  %v257_v20 = vand.u32 4294901760, %v256_v13  ;;  %v263_v22 = vand.u32 4294901760, %v262_v14  ;;  %v269_v23 = vand.u32 4294901760, %v268_v15  ;;  %v2134_v31 = vand.u32 4294901760, %v53_v19 }
   0x7   :  { %v115_v21 = vsub.f32 %v47_v10, %v2122_v16  ;;  %464 = vmatpush.msra.mxu3 %v2097_v4  ;;  %v275_v24 = vand.u32 4294901760, %v274_v17  ;;  %v123_v25 = vsub.f32 %v50_v11, %v2125_v18  ;;  %v24_v38 = vld [vmem:[%s3193_s0 + $0x18] sm:$0xff]  ;;  %v25_v46 = vld [vmem:[%s3193_s0 + $0x20] sm:$0xff]  ;;  %v26_v53 = vld [vmem:[%s3193_s0 + $0x28] sm:$0xff]  ;;  %vm1640_vm4 = vcmask 64512   ;;  %s1953_s15 = sshll.u32 %s3198_s5, 4  ;;  %s1954_s15 = int_to_ptr.hbm [resolvable:$true] %s1953_s15 }
   0x8   :  { %111 = vmatpush.msra.mxu0 %v2099_v5  ;;  %361 = vmatpush.msra.mxu2 %v262_v14  ;;  %v258_v26 = vsub.f32 %v256_v13, %v257_v20  ;;  %v264_v28 = vsub.f32 %v262_v14, %v263_v22  ;;  %v270_v29 = vsub.f32 %v268_v15, %v269_v23  ;;  %v56_v42 = vsel %vm45_vm0, %v24_v38, 0  ;;  %v27_v60 = vld [vmem:[%s3193_s0 + $0x30] sm:$0xff]  ;;  %v29_v10 = vld [vmem:[%s3193_s0 + $0x40] sm:$0xff] }
   0x9   :  { %v116_v27 = vand.u32 4294901760, %v115_v21  ;;  %466 = vmatpush.msra.mxu3 %v2099_v5  ;;  %v276_v30 = vsub.f32 %v274_v17, %v275_v24  ;;  %v124_v35 = vand.u32 4294901760, %v123_v25  ;;  %v131_v41 = vsub.f32 %v53_v19, %v2134_v31  ;;  %v30_v19 = vld [vmem:[%s3193_s0 + $0x48] sm:$0xff] }
   0xa   :  { %113 = vmatpush.msra.mxu0 %v2110_v9  ;;  %v259_v32 = vand.u32 4294901760, %v258_v26  ;;  %364 = vmatpush.msra.mxu2 %v268_v15  ;;  %v265_v34 = vand.u32 4294901760, %v264_v28  ;;  %v271_v37 = vand.u32 4294901760, %v270_v29  ;;  %v2143_v45 = vand.u32 4294901760, %v56_v42  ;;  %v31_v26 = vld [vmem:[%s3193_s0 + $0x50] sm:$0xff] }
   0xb   :  { %v117_v33 = vsub.f32 %v115_v21, %v116_v27  ;;  %468 = vmatpush.msra.mxu3 %v2110_v9  ;;  %v277_v39 = vand.u32 4294901760, %v276_v30  ;;  %v125_v40 = vsub.f32 %v123_v25, %v124_v35  ;;  %v132_v44 = vand.u32 4294901760, %v131_v41 }
   0xc   :  { %581 = vmatpush.msrb.mxu0 %v257_v20  ;;  %260 = vmatpush.msra.mxu1 %v259_v32  ;;  %v139_v48 = vsub.f32 %v56_v42, %v2143_v45  ;;  %v59_v49 = vsel %vm45_vm0, %v25_v46, 0  ;;  %v62_v56 = vsel %vm45_vm0, %v26_v53, 0  ;;  %v65_v63 = vsel %vm45_vm0, %v27_v60, 0 }
   0xd   :  { %v118_v36 = vand.u32 4294901760, %v117_v33  ;;  %367 = vmatpush.msra.mxu2 %v274_v17  ;;  %472 = vmatmul.f32.vlgmr.msra.gmra.mxu3 %v116_v27  ;;  %v126_v43 = vand.u32 4294901760, %v125_v40  ;;  %v133_v47 = vsub.f32 %v131_v41, %v132_v44  ;;  %v2154_v52 = vand.u32 4294901760, %v59_v49 }
   0xe   :  { %370 = vmatmul.f32.vlgmr.msra.gmra.mxu2 %v115_v21  ;;  %266 = vmatpush.msra.mxu1 %v265_v34  ;;  %v140_v51 = vand.u32 4294901760, %v139_v48  ;;  %v2163_v59 = vand.u32 4294901760, %v62_v56  ;;  %v2171_v2 = vand.u32 4294901760, %v65_v63  ;;  %v71_v13 = vsel %vm45_vm0, %v29_v10, 0  ;;  %v32_v34 = vld [vmem:[%s3193_s0 + $0x58] sm:$0xff] }
   0xf   :  { %119 = vmatmul.f32.vlgmr.msra.gmra.mxu0 %v118_v36  ;;  %v134_v50 = vand.u32 4294901760, %v133_v47  ;;  %v147_v55 = vsub.f32 %v59_v49, %v2154_v52  ;;  %v2187_v17 = vand.u32 4294901760, %v71_v13  ;;  %v77_v29 = vsel %vm45_vm0, %v31_v26, 0  ;;  %v34_v49 = vld [vmem:[%s3193_s0 + $0x68] sm:$0xff] }
  0x10   :  { %585 = vmatpush.msrb.mxu0 %v263_v22  ;;  %272 = vmatpush.msra.mxu1 %v271_v37  ;;  %v141_v54 = vsub.f32 %v139_v48, %v140_v51  ;;  %v155_v62 = vsub.f32 %v62_v56, %v2163_v59  ;;  %v74_v22 = vsel %vm45_vm0, %v30_v19, 0  ;;  %v2203_v33 = vand.u32 4294901760, %v77_v29 }
  0x11   :  { %v148_v58 = vand.u32 4294901760, %v147_v55  ;;  %v179_v21 = vsub.f32 %v71_v13, %v2187_v17  ;;  %v80_v37 = vsel %vm45_vm0, %v32_v34, 0  ;;  %v86_v53 = vsel %vm45_vm0, %v34_v49, 0  ;;  %v773_v34 = vld [vmem:[%s3196_s3 + $0x68] sm:$0xff] }
  0x12   :  { %589 = vmatpush.msrb.mxu0 %v269_v23  ;;  %278 = vmatpush.msra.mxu1 %v277_v39  ;;  %v142_v57 = vand.u32 4294901760, %v141_v54  ;;  %v156_v1 = vand.u32 4294901760, %v155_v62  ;;  %v195_v36 = vsub.f32 %v77_v29, %v2203_v33  ;;  %v2211_v40 = vand.u32 4294901760, %v80_v37 }
  0x13   :  { %280 = vmatmul.f32.vlgmr.msra.gmra.mxu1 %v2122_v16  ;;  %v149_v61 = vsub.f32 %v147_v55, %v148_v58  ;;  %v2227_v56 = vand.u32 4294901760, %v86_v53 }
  0x14   :  { %593 = vmatpush.msrb.mxu0 %v275_v24  ;;  %672 = vmatpush.msrb.mxu1 %v2095_v3  ;;  %v28_v3 = vld [vmem:[%s3193_s0 + $0x38] sm:$0xff]  ;;  %v180_v24 = vand.u32 4294901760, %v179_v21  ;;  %v196_v39 = vand.u32 4294901760, %v195_v36 }
  0x15   :  { %478 = vmatmul.f32.gmra.mxu3 %v124_v35  ;;  %v150_v0 = vand.u32 4294901760, %v149_v61  ;;  %v68_v6 = vsel %vm45_vm0, %v28_v3, 0  ;;  %v219_v60 = vsub.f32 %v86_v53, %v2227_v56  ;;  %v771_v53 = vld [vmem:[%s3196_s3 + $0x58] sm:$0xff] }
  0x16   :  { %375 = vmatmul.f32.gmra.mxu2 %v123_v25  ;;  %674 = vmatpush.msrb.mxu1 %v2097_v4  ;;  %v157_v4 = vsub.f32 %v155_v62, %v156_v1  ;;  %v2195_v25 = vand.u32 4294901760, %v74_v22  ;;  %v181_v27 = vsub.f32 %v179_v21, %v180_v24  ;;  %v197_v42 = vsub.f32 %v195_v36, %v196_v39 }
  0x17   :  { %127 = vmatmul.f32.gmra.mxu0 %v126_v43  ;;  %v203_v43 = vsub.f32 %v80_v37, %v2211_v40 }
  0x18   :  { %676 = vmatpush.msrb.mxu1 %v2099_v5  ;;  %v163_v5 = vsub.f32 %v65_v63, %v2171_v2  ;;  %v158_v7 = vand.u32 4294901760, %v157_v4  ;;  %v187_v28 = vsub.f32 %v74_v22, %v2195_v25  ;;  %v182_v30 = vand.u32 4294901760, %v181_v27 }
  0x19   :  { %v198_v46 = vand.u32 4294901760, %v197_v42  ;;  %v204_v47 = vand.u32 4294901760, %v203_v43  ;;  %v220_v63 = vand.u32 4294901760, %v219_v60 }
  0x1a   :  { %678 = vmatpush.msrb.mxu1 %v2110_v9  ;;  %v164_v8 = vand.u32 4294901760, %v163_v5  ;;  %v2179_v9 = vand.u32 4294901760, %v68_v6  ;;  %v188_v32 = vand.u32 4294901760, %v187_v28 }
  0x1b   :  { %284 = vmatmul.f32.gmra.mxu1 %v2125_v18  ;;  %v221_v3 = vsub.f32 %v219_v60, %v220_v63 }
  0x1c   :  { %v165_v11 = vsub.f32 %v163_v5, %v164_v8  ;;  %v171_v12 = vsub.f32 %v68_v6, %v2179_v9  ;;  %v189_v35 = vsub.f32 %v187_v28, %v188_v32 }
  0x1d   :  { %484 = vmatmul.f32.gmra.mxu3 %v132_v44  ;;  %v222_v6 = vand.u32 4294901760, %v221_v3 }
  0x1e   :  { %380 = vmatmul.f32.gmra.mxu2 %v131_v41  ;;  %v166_v14 = vand.u32 4294901760, %v165_v11  ;;  %v172_v15 = vand.u32 4294901760, %v171_v12  ;;  %v190_v38 = vand.u32 4294901760, %v189_v35  ;;  %v33_v41 = vld [vmem:[%s3193_s0 + $0x60] sm:$0xff] }
  0x1f   :  { %135 = vmatmul.f32.gmra.mxu0 %v134_v50  ;;  %v83_v44 = vsel %vm45_vm0, %v33_v41, 0  ;;  %v205_v50 = vsub.f32 %v203_v43, %v204_v47 }
  0x20   :  { %v173_v20 = vsub.f32 %v171_v12, %v172_v15 }
  0x21   :  { %v206_v54 = vand.u32 4294901760, %v205_v50 }
  0x22   :  { %v174_v23 = vand.u32 4294901760, %v173_v20 }
  0x23   :  { %288 = vmatmul.f32.gmra.mxu1 %v2134_v31 }
  0x25   :  { %490 = vmatmul.f32.gmra.mxu3 %v140_v51 }
  0x26   :  { %385 = vmatmul.f32.gmra.mxu2 %v139_v48  ;;  %v2219_v48 = vand.u32 4294901760, %v83_v44 }
  0x27   :  { %143 = vmatmul.f32.gmra.mxu0 %v142_v57  ;;  %v35_v57 = vld [vmem:[%s3193_s0 + $0x70] sm:$0xff] }
  0x28   :  { %v211_v51 = vsub.f32 %v83_v44, %v2219_v48  ;;  %v89_v61 = vsel %vm45_vm0, %v35_v57, 0 }
  0x2b   :  { %292 = vmatmul.f32.gmra.mxu1 %v2143_v45 }
  0x2d   :  { %496 = vmatmul.f32.gmra.mxu3 %v148_v58 }
  0x2e   :  { %390 = vmatmul.f32.gmra.mxu2 %v147_v55  ;;  %v212_v55 = vand.u32 4294901760, %v211_v51 }
  0x2f   :  { %151 = vmatmul.f32.gmra.mxu0 %v150_v0  ;;  %v2235_v0 = vand.u32 4294901760, %v89_v61 }
  0x30   :  { %v213_v58 = vsub.f32 %v211_v51, %v212_v55 }
  0x31   :  { %v227_v4 = vsub.f32 %v89_v61, %v2235_v0 }
  0x33   :  { %296 = vmatmul.f32.gmra.mxu1 %v2154_v52 }
  0x35   :  { %502 = vmatmul.f32.gmra.mxu3 %v156_v1  ;;  %v36_v1 = vld [vmem:[%s3193_s0 + $0x78] sm:$0xff] }
  0x36   :  { %395 = vmatmul.f32.gmra.mxu2 %v155_v62  ;;  %v214_v62 = vand.u32 4294901760, %v213_v58 }
  0x37   :  { %159 = vmatmul.f32.gmra.mxu0 %v158_v7  ;;  %v228_v7 = vand.u32 4294901760, %v227_v4 }
  0x39   :  { %v229_v10 = vsub.f32 %v227_v4, %v228_v7 }
  0x3b   :  { %300 = vmatmul.f32.gmra.mxu1 %v2163_v59 }
  0x3d   :  { %508 = vmatmul.f32.gmra.mxu3 %v164_v8 }
  0x3e   :  { %400 = vmatmul.f32.gmra.mxu2 %v163_v5  ;;  %v92_v5 = vsel %vm45_vm0, %v36_v1, 0 }
  0x3f   :  { %167 = vmatmul.f32.gmra.mxu0 %v166_v14  ;;  %v2243_v8 = vand.u32 4294901760, %v92_v5 }
  0x41   :  { %v235_v11 = vsub.f32 %v92_v5, %v2243_v8 }
  0x43   :  { %304 = vmatmul.f32.gmra.mxu1 %v2171_v2  ;;  %v236_v13 = vand.u32 4294901760, %v235_v11 }
  0x45   :  { %514 = vmatmul.f32.gmra.mxu3 %v172_v15  ;;  %v237_v14 = vsub.f32 %v235_v11, %v236_v13  ;;  %v775_v15 = vld [vmem:[%s3196_s3 + $0x78] sm:$0xff] }
  0x46   :  { %405 = vmatmul.f32.gmra.mxu2 %v171_v12  ;;  %v230_v12 = vand.u32 4294901760, %v229_v10  ;;  %v2251_v19 = vand.u32 4294901760, %v775_v15 }
  0x47   :  { %175 = vmatmul.f32.gmra.mxu0 %v174_v23 }
  0x48   :  { %781 = vmatpush.msrb.mxu2 %v2251_v19  ;;  %v2255_v20 = vsub.f32 %v775_v15, %v2251_v19  ;;  %1232 = vmatpush.msra.mxu1 %v2251_v19 }
  0x4a   :  { %v3211_v22 = vand.u32 4294901760, %v2255_v20  ;;  %1104 = vmatpush.msra.mxu0 %v2255_v20 }
  0x4b   :  { %308 = vmatmul.f32.gmra.mxu1 %v2179_v9 }
  0x4c   :  { %v944_v23 = vsub.f32 %v2255_v20, %v3211_v22 }
  0x4d   :  { %520 = vmatmul.f32.gmra.mxu3 %v180_v24  ;;  %v774_v24 = vld [vmem:[%s3196_s3 + $0x70] sm:$0xff] }
  0x4e   :  { %410 = vmatmul.f32.gmra.mxu2 %v179_v21  ;;  %v238_v21 = vand.u32 4294901760, %v237_v14  ;;  %v945_v26 = vand.u32 4294901760, %v944_v23  ;;  %v2267_v27 = vand.u32 4294901760, %v774_v24 }
  0x4f   :  { %183 = vmatmul.f32.gmra.mxu0 %v182_v30 }
  0x50   :  { %946 = vmatpush.msrb.mxu3 %v945_v26  ;;  %783 = vmatpush.msrb.mxu2 %v2267_v27 }
  0x51   :  { %1234 = vmatpush.msra.mxu1 %v2267_v27 }
  0x53   :  { %312 = vmatmul.f32.gmra.mxu1 %v2187_v17 }
  0x55   :  { %526 = vmatmul.f32.gmra.mxu3 %v188_v32 }
  0x56   :  { %415 = vmatmul.f32.gmra.mxu2 %v187_v28  ;;  %v2271_v28 = vsub.f32 %v774_v24, %v2267_v27 }
  0x57   :  { %191 = vmatmul.f32.gmra.mxu0 %v190_v38 }
  0x58   :  { %v3210_v30 = vand.u32 4294901760, %v2271_v28  ;;  %1107 = vmatpush.msra.mxu0 %v2271_v28 }
  0x5a   :  { %v950_v32 = vsub.f32 %v2271_v28, %v3210_v30 }
  0x5b   :  { %316 = vmatmul.f32.gmra.mxu1 %v2195_v25 }
  0x5c   :  { %v951_v35 = vand.u32 4294901760, %v950_v32 }
  0x5d   :  { %532 = vmatmul.f32.gmra.mxu3 %v196_v39 }
  0x5e   :  { %420 = vmatmul.f32.gmra.mxu2 %v195_v36  ;;  %v2286_v36 = vand.u32 4294901760, %v773_v34  ;;  %952 = vmatpush.msrb.mxu3 %v951_v35 }
  0x5f   :  { %199 = vmatmul.f32.gmra.mxu0 %v198_v46 }
  0x60   :  { %785 = vmatpush.msrb.mxu2 %v2286_v36  ;;  %v2292_v38 = vsub.f32 %v773_v34, %v2286_v36  ;;  %1236 = vmatpush.msra.mxu1 %v2286_v36 }
  0x62   :  { %v3208_v41 = vand.u32 4294901760, %v2292_v38  ;;  %1110 = vmatpush.msra.mxu0 %v2292_v38 }
  0x63   :  { %320 = vmatmul.f32.gmra.mxu1 %v2203_v33 }
  0x64   :  { %v956_v42 = vsub.f32 %v2292_v38, %v3208_v41 }
  0x65   :  { %538 = vmatmul.f32.gmra.mxu3 %v204_v47 }
  0x66   :  { %425 = vmatmul.f32.gmra.mxu2 %v203_v43  ;;  %v772_v43 = vld [vmem:[%s3196_s3 + $0x60] sm:$0xff]  ;;  %v957_v44 = vand.u32 4294901760, %v956_v42  ;;  %v767_v42 = vld [vmem:[%s3196_s3 + $0x38] sm:$0xff] }
  0x67   :  { %207 = vmatmul.f32.gmra.mxu0 %v206_v54  ;;  %v2307_v46 = vand.u32 4294901760, %v772_v43 }
  0x68   :  { %958 = vmatpush.msrb.mxu3 %v957_v44  ;;  %v2412_v44 = vand.u32 4294901760, %v767_v42 }
  0x69   :  { %787 = vmatpush.msrb.mxu2 %v2307_v46  ;;  %1238 = vmatpush.msra.mxu1 %v2307_v46 }
  0x6b   :  { %324 = vmatmul.f32.gmra.mxu1 %v2211_v40 }
  0x6d   :  { %544 = vmatmul.f32.gmra.mxu3 %v212_v55  ;;  %v2328_v55 = vand.u32 4294901760, %v771_v53 }
  0x6e   :  { %430 = vmatmul.f32.gmra.mxu2 %v211_v51 }
  0x6f   :  { %215 = vmatmul.f32.gmra.mxu0 %v214_v62  ;;  %789 = vmatpush.msrb.mxu2 %v2328_v55  ;;  %v770_v62 = vld [vmem:[%s3196_s3 + $0x50] sm:$0xff] }
  0x70   :  { %1240 = vmatpush.msra.mxu1 %v2328_v55  ;;  %v2349_v1 = vand.u32 4294901760, %v770_v62 }
  0x72   :  { %791 = vmatpush.msrb.mxu2 %v2349_v1  ;;  %1242 = vmatpush.msra.mxu1 %v2349_v1 }
  0x73   :  { %328 = vmatmul.f32.gmra.mxu1 %v2219_v48 }
  0x75   :  { %550 = vmatmul.f32.gmra.mxu3 %v220_v63 }
  0x76   :  { %435 = vmatmul.f32.gmra.mxu2 %v219_v60 }
  0x77   :  { %223 = vmatmul.f32.gmra.mxu0 %v222_v6 }
  0x7b   :  { %332 = vmatmul.f32.gmra.mxu1 %v2227_v56 }
  0x7d   :  { %556 = vmatmul.f32.gmra.mxu3 %v228_v7  ;;  %v769_v7 = vld [vmem:[%s3196_s3 + $0x48] sm:$0xff] }
  0x7e   :  { %440 = vmatmul.f32.gmra.mxu2 %v227_v4 }
  0x7f   :  { %231 = vmatmul.f32.gmra.mxu0 %v230_v12 }
  0x83   :  { %336 = vmatmul.f32.gmra.mxu1 %v2235_v0 }
  0x85   :  { %562 = vmatmul.f32.gmra.mxu3 %v236_v13 }
  0x86   :  { %445 = vmatmul.f32.gmra.mxu2 %v235_v11  ;;  %v2370_v11 = vand.u32 4294901760, %v769_v7 }
  0x87   :  { %239 = vmatmul.f32.gmra.mxu0 %v238_v21  ;;  %v768_v21 = vld [vmem:[%s3196_s3 + $0x40] sm:$0xff] }
  0x88   :  { %793 = vmatpush.msrb.mxu2 %v2370_v11  ;;  %1244 = vmatpush.msra.mxu1 %v2370_v11  ;;  %v2391_v24 = vand.u32 4294901760, %v768_v21 }
  0x8a   :  { %795 = vmatpush.msrb.mxu2 %v2391_v24  ;;  %1246 = vmatpush.msra.mxu1 %v2391_v24 }
  0x8b   :  { %340 = vmatmul.f32.gmra.mxu1 %v2243_v8 }
  0x8c   :  { %v2274_v29 = vpop.f32.mrf.mxu0  ;;  %797 = vmatpush.msrb.mxu2 %v2412_v44  ;;  %1248 = vmatpush.msra.mxu1 %v2412_v44 }
  0x8f   :  { %595 = vmatmul.f32.vlgmr.msrb.gmra.mxu0 %v2122_v16 }
  0x90   :  { %v2288_v37 = vpop.f32.mrf.mxu1 }
  0x93   :  { %680 = vmatmul.f32.vlgmr.msrb.gmra.mxu1 %v2122_v16  ;;  %v2313_v16 = vsub.f32 %v772_v43, %v2307_v46 }
  0x94   :  { %v2295_v39 = vpop.f32.mrf.mxu0 }
  0x95   :  { %v3207_v50 = vand.u32 4294901760, %v2313_v16  ;;  %1113 = vmatpush.msra.mxu0 %v2313_v16 }
  0x97   :  { %599 = vmatmul.f32.gmra.mxu0 %v2125_v18  ;;  %v962_v51 = vsub.f32 %v2313_v16, %v3207_v50  ;;  %v2519_v50 = vpop.f32.mrf.mxu2 }
  0x98   :  { %v2309_v47 = vpop.f32.mrf.mxu1 }
  0x99   :  { %v963_v54 = vand.u32 4294901760, %v962_v51 }
  0x9b   :  { %684 = vmatmul.f32.gmra.mxu1 %v2125_v18  ;;  %964 = vmatpush.msrb.mxu3 %v963_v54  ;;  %v2334_v18 = vsub.f32 %v771_v53, %v2328_v55 }
  0x9c   :  { %v2316_v49 = vpop.f32.mrf.mxu0 }
  0x9d   :  { %v3206_v60 = vand.u32 4294901760, %v2334_v18  ;;  %1116 = vmatpush.msra.mxu0 %v2334_v18 }
  0x9f   :  { %603 = vmatmul.f32.gmra.mxu0 %v2134_v31  ;;  %v968_v61 = vsub.f32 %v2334_v18, %v3206_v60 }
  0xa0   :  { %v2330_v57 = vpop.f32.mrf.mxu1 }
  0xa1   :  { %v969_v63 = vand.u32 4294901760, %v968_v61 }
  0xa3   :  { %688 = vmatmul.f32.gmra.mxu1 %v2134_v31  ;;  %970 = vmatpush.msrb.mxu3 %v969_v63  ;;  %v2355_v31 = vsub.f32 %v770_v62, %v2349_v1  ;;  %v766_v62 = vld [vmem:[%s3196_s3 + $0x30] sm:$0xff] }
  0xa4   :  { %v2337_v58 = vpop.f32.mrf.mxu0 }
  0xa5   :  { %v3205_v5 = vand.u32 4294901760, %v2355_v31  ;;  %1119 = vmatpush.msra.mxu0 %v2355_v31 }
  0xa7   :  { %607 = vmatmul.f32.gmra.mxu0 %v2143_v45  ;;  %v974_v6 = vsub.f32 %v2355_v31, %v3205_v5 }
  0xa8   :  { %v2351_v3 = vpop.f32.mrf.mxu1 }
  0xa9   :  { %v975_v10 = vand.u32 4294901760, %v974_v6  ;;  %v2433_v6 = vand.u32 4294901760, %v766_v62 }
  0xab   :  { %692 = vmatmul.f32.gmra.mxu1 %v2143_v45  ;;  %976 = vmatpush.msrb.mxu3 %v975_v10  ;;  %v2376_v45 = vsub.f32 %v769_v7, %v2370_v11 }
  0xac   :  { %v2358_v4 = vpop.f32.mrf.mxu0  ;;  %799 = vmatpush.msrb.mxu2 %v2433_v6  ;;  %1250 = vmatpush.msra.mxu1 %v2433_v6 }
  0xad   :  { %v3203_v14 = vand.u32 4294901760, %v2376_v45  ;;  %1122 = vmatpush.msra.mxu0 %v2376_v45 }
  0xaf   :  { %611 = vmatmul.f32.gmra.mxu0 %v2154_v52  ;;  %v980_v15 = vsub.f32 %v2376_v45, %v3203_v14 }
  0xb0   :  { %v2372_v12 = vpop.f32.mrf.mxu1 }
  0xb1   :  { %v981_v23 = vand.u32 4294901760, %v980_v15 }
  0xb3   :  { %696 = vmatmul.f32.gmra.mxu1 %v2154_v52  ;;  %982 = vmatpush.msrb.mxu3 %v981_v23  ;;  %v2397_v52 = vsub.f32 %v768_v21, %v2391_v24  ;;  %v765_v23 = vld [vmem:[%s3196_s3 + $0x28] sm:$0xff] }
  0xb4   :  { %v2379_v13 = vpop.f32.mrf.mxu0 }
  0xb5   :  { %v3202_v34 = vand.u32 4294901760, %v2397_v52  ;;  %1125 = vmatpush.msra.mxu0 %v2397_v52 }
  0xb7   :  { %615 = vmatmul.f32.gmra.mxu0 %v2163_v59  ;;  %v986_v35 = vsub.f32 %v2397_v52, %v3202_v34 }
  0xb8   :  { %v2393_v26 = vpop.f32.mrf.mxu1 }
  0xb9   :  { %v987_v43 = vand.u32 4294901760, %v986_v35 }
  0xbb   :  { %700 = vmatmul.f32.gmra.mxu1 %v2163_v59  ;;  %988 = vmatpush.msrb.mxu3 %v987_v43  ;;  %v2418_v59 = vsub.f32 %v767_v42, %v2412_v44  ;;  %v2454_v42 = vand.u32 4294901760, %v765_v23 }
  0xbc   :  { %v2400_v32 = vpop.f32.mrf.mxu0 }
  0xbd   :  { %v3201_v54 = vand.u32 4294901760, %v2418_v59  ;;  %1128 = vmatpush.msra.mxu0 %v2418_v59  ;;  %801 = vmatpush.msrb.mxu2 %v2454_v42 }
  0xbe   :  { %1252 = vmatpush.msra.mxu1 %v2454_v42 }
  0xbf   :  { %619 = vmatmul.f32.gmra.mxu0 %v2171_v2  ;;  %v992_v61 = vsub.f32 %v2418_v59, %v3201_v54 }
  0xc0   :  { %v2414_v51 = vpop.f32.mrf.mxu1 }
  0xc1   :  { %v993_v63 = vand.u32 4294901760, %v992_v61 }
  0xc3   :  { %704 = vmatmul.f32.gmra.mxu1 %v2171_v2  ;;  %994 = vmatpush.msrb.mxu3 %v993_v63  ;;  %v2439_v2 = vsub.f32 %v766_v62, %v2433_v6 }
  0xc4   :  { %v2421_v53 = vpop.f32.mrf.mxu0 }
  0xc5   :  { %v3199_v15 = vand.u32 4294901760, %v2439_v2  ;;  %1131 = vmatpush.msra.mxu0 %v2439_v2 }
  0xc7   :  { %623 = vmatmul.f32.gmra.mxu0 %v2179_v9  ;;  %v998_v21 = vsub.f32 %v2439_v2, %v3199_v15 }
  0xc8   :  { %v2435_v7 = vpop.f32.mrf.mxu1 }
  0xc9   :  { %v999_v35 = vand.u32 4294901760, %v998_v21  ;;  %v764_v21 = vld [vmem:[%s3196_s3 + $0x20] sm:$0xff] }
  0xcb   :  { %708 = vmatmul.f32.gmra.mxu1 %v2179_v9  ;;  %1000 = vmatpush.msrb.mxu3 %v999_v35  ;;  %v2460_v9 = vsub.f32 %v765_v23, %v2454_v42  ;;  %v2475_v35 = vand.u32 4294901760, %v764_v21 }
  0xcc   :  { %v2442_v10 = vpop.f32.mrf.mxu0 }
  0xcd   :  { %3214 = vst [vmem:[#allocation5_spill] sm:$0xff] %v2442_v10  ;;  %v3200_v62 = vand.u32 4294901760, %v2460_v9  ;;  %1134 = vmatpush.msra.mxu0 %v2460_v9  ;;  %803 = vmatpush.msrb.mxu2 %v2475_v35  ;;  %v3227_v10 = vand.u32 4294901760, %v2313_v16  ;;  %v3230_v16 = vand.u32 4294901760, %v2376_v45 }
  0xce   :  { %1254 = vmatpush.msra.mxu1 %v2475_v35 }
  0xcf   :  { %627 = vmatmul.f32.gmra.mxu0 %v2187_v17  ;;  %v1004_v63 = vsub.f32 %v2460_v9, %v3200_v62 }
  0xd0   :  { %v2456_v43 = vpop.f32.mrf.mxu1 }
  0xd1   :  { %3215 = vst [vmem:[#allocation6_spill] sm:$0xff] %v2456_v43  ;;  %v1005_v23 = vand.u32 4294901760, %v1004_v63 }
  0xd3   :  { %712 = vmatmul.f32.gmra.mxu1 %v2187_v17  ;;  %1006 = vmatpush.msrb.mxu3 %v1005_v23  ;;  %v2481_v17 = vsub.f32 %v764_v21, %v2475_v35  ;;  %v763_v21 = vld [vmem:[%s3196_s3 + $0x18] sm:$0xff] }
  0xd4   :  { %v2463_v61 = vpop.f32.mrf.mxu0  ;;  %v2496_v34 = vand.u32 4294901760, %v763_v21 }
  0xd5   :  { %3216 = vst [vmem:[#allocation7_spill] sm:$0xff] %v2463_v61  ;;  %v3204_v54 = vand.u32 4294901760, %v2481_v17  ;;  %1137 = vmatpush.msra.mxu0 %v2481_v17  ;;  %v3225_v61 = vand.u32 4294901760, %v2271_v28 }
  0xd6   :  { %805 = vmatpush.msrb.mxu2 %v2496_v34  ;;  %1256 = vmatpush.msra.mxu1 %v2496_v34 }
  0xd7   :  { %631 = vmatmul.f32.gmra.mxu0 %v2195_v25  ;;  %v1010_v63 = vsub.f32 %v2481_v17, %v3204_v54 }
  0xd8   :  { %v2477_v15 = vpop.f32.mrf.mxu1 }
  0xd9   :  { %3217 = vst [vmem:[#allocation8_spill] sm:$0xff] %v2477_v15  ;;  %v1011_v23 = vand.u32 4294901760, %v1010_v63 }
  0xdb   :  { %716 = vmatmul.f32.gmra.mxu1 %v2195_v25  ;;  %1012 = vmatpush.msrb.mxu3 %v1011_v23  ;;  %v2502_v25 = vsub.f32 %v763_v21, %v2496_v34  ;;  %v762_v21 = vld [vmem:[%s3196_s3 + $0x10] sm:$0xff] }
  0xdc   :  { %v2484_v62 = vpop.f32.mrf.mxu0  ;;  %v2517_v60 = vand.u32 4294901760, %v762_v21 }
  0xdd   :  { %3218 = vst [vmem:[#allocation9_spill] sm:$0xff] %v2484_v62  ;;  %v3209_v5 = vand.u32 4294901760, %v2502_v25  ;;  %1140 = vmatpush.msra.mxu0 %v2502_v25 }
  0xde   :  { %807 = vmatpush.msrb.mxu2 %v2517_v60  ;;  %v2525_v41 = vsub.f32 %v762_v21, %v2517_v60  ;;  %1258 = vmatpush.msra.mxu1 %v2517_v60  ;;  %v760_v21 = vld [vmem:[%s3196_s3] sm:$0xff] }
  0xdf   :  { %635 = vmatmul.f32.gmra.mxu0 %v2203_v33  ;;  %v1016_v63 = vsub.f32 %v2502_v25, %v3209_v5  ;;  %v761_v5 = vld [vmem:[%s3196_s3 + $0x8] sm:$0xff] }
  0xe0   :  { %v2498_v14 = vpop.f32.mrf.mxu1  ;;  %v2535_v22 = vand.u32 4294901760, %v761_v5  ;;  %1143 = vmatpush.msra.mxu0 %v2525_v41 }
  0xe1   :  { %3219 = vst [vmem:[#allocation10_spill] sm:$0xff] %v2498_v14  ;;  %v1017_v23 = vand.u32 4294901760, %v1016_v63  ;;  %v3212_v63 = vand.u32 4294901760, %v2525_v41 }
  0xe2   :  { %809 = vmatpush.msrb.mxu2 %v2535_v22  ;;  %1260 = vmatpush.msra.mxu1 %v2535_v22 }
  0xe3   :  { %720 = vmatmul.f32.gmra.mxu1 %v2203_v33  ;;  %1018 = vmatpush.msrb.mxu3 %v1017_v23  ;;  %v2538_v23 = vpop.f32.mrf.mxu3 }
  0xe4   :  { %v2505_v54 = vpop.f32.mrf.mxu0 }
  0xe5   :  { %3220 = vst [vmem:[#allocation11_spill] sm:$0xff] %v2505_v54 }
  0xe7   :  { %639 = vmatmul.f32.gmra.mxu0 %v2211_v40 }
  0xe8   :  { %v2521_v33 = vpop.f32.mrf.mxu1 }
  0xe9   :  { %3221 = vst [vmem:[#allocation12_spill] sm:$0xff] %v2521_v33  ;;  %v1022_v33 = vsub.f32 %v2525_v41, %v3212_v63 }
  0xeb   :  { %724 = vmatmul.f32.gmra.mxu1 %v2211_v40  ;;  %v2548_v40 = vsub.f32 %v761_v5, %v2535_v22  ;;  %v1023_v54 = vand.u32 4294901760, %v1022_v33  ;;  %v3224_v5 = vand.u32 4294901760, %v2255_v20  ;;  %v479_v43 = vpop.f32.mrf.mxu3 }
  0xec   :  { %v2531_v30 = vpop.f32.mrf.mxu0 }
  0xed   :  { %3222 = vst [vmem:[#allocation13_spill] sm:$0xff] %v2531_v30  ;;  %v2550_v30 = vand.u32 4294901760, %v760_v21  ;;  %v3213_v14 = vand.u32 4294901760, %v2548_v40  ;;  %1146 = vmatpush.msra.mxu0 %v2548_v40  ;;  %1024 = vmatpush.msrb.mxu3 %v1023_v54 }
  0xef   :  { %643 = vmatmul.f32.gmra.mxu0 %v2219_v48  ;;  %v2556_v62 = vsub.f32 %v760_v21, %v2550_v30  ;;  %811 = vmatpush.msrb.mxu2 %v2550_v30  ;;  %v1028_v33 = vsub.f32 %v2548_v40, %v3213_v14  ;;  %v2570_v21 = vpop.f32.mrf.mxu2 }
  0xf0   :  { %v2560_v63 = vpop.f32.mrf.mxu1  ;;  %1262 = vmatpush.msra.mxu1 %v2550_v30 }
  0xf1   :  { %3223 = vst [vmem:[#allocation14_spill] sm:$0xff] %v2560_v63  ;;  %1363 = vmatpush.msra.mxu2 %v3224_v5  ;;  %v1033_v15 = vand.u32 4294901760, %v2556_v62  ;;  %1149 = vmatpush.msra.mxu0 %v2556_v62  ;;  %v1029_v20 = vand.u32 4294901760, %v1028_v33  ;;  %v3226_v5 = vand.u32 4294901760, %v2292_v38  ;;  %v3229_v38 = vand.u32 4294901760, %v2355_v31 }
  0xf2   :  { %v3232_v31 = vand.u32 4294901760, %v2418_v59 }
  0xf3   :  { %1367 = vmatpush.msra.mxu2 %v3225_v61  ;;  %728 = vmatmul.f32.gmra.mxu1 %v2219_v48  ;;  %v1034_v54 = vsub.f32 %v2556_v62, %v1033_v15  ;;  %v3228_v48 = vand.u32 4294901760, %v2334_v18  ;;  %v485_v18 = vpop.f32.mrf.mxu3 }
  0xf4   :  { %v2574_v63 = vpop.f32.mrf.mxu0  ;;  %1030 = vmatpush.msrb.mxu3 %v1029_v20 }
  0xf5   :  { %1371 = vmatpush.msra.mxu2 %v3226_v5  ;;  %v1035_v14 = vand.u32 4294901760, %v1034_v54 }
  0xf7   :  { %647 = vmatmul.f32.gmra.mxu0 %v2227_v56  ;;  %1375 = vmatpush.msra.mxu2 %v3227_v10  ;;  %v381_v62 = vpop.f32.mrf.mxu2 }
  0xf8   :  { %1036 = vmatpush.msrb.mxu3 %v1035_v14  ;;  %v2583_v28 = vpop.f32.mrf.mxu1 }
  0xf9   :  { %1379 = vmatpush.msra.mxu2 %v3228_v48 }
  0xfa   :  { %1490 = vmatpush.msra.mxu3 %v2251_v19  ;;  %v2600_v19 = vld [vmem:[%s3195_s2] ss:$0 sm:$0xff] }
  0xfb   :  { %1383 = vmatpush.msra.mxu2 %v3229_v38  ;;  %732 = vmatmul.f32.gmra.mxu1 %v2227_v56  ;;  %v491_v59 = vpop.f32.mrf.mxu3 }
  0xfc   :  { %1492 = vmatpush.msra.mxu3 %v2267_v27  ;;  %v2591_v61 = vpop.f32.mrf.mxu0  ;;  %v3231_v27 = vand.u32 4294901760, %v2397_v52 }
  0xfd   :  { %1387 = vmatpush.msra.mxu2 %v3230_v16 }
  0xfe   :  { %1494 = vmatpush.msra.mxu3 %v2286_v36  ;;  %v121_v36 = vadd.f32 %v2600_v19, %v2274_v29 }
  0xff   :  { %651 = vmatmul.f32.gmra.mxu0 %v2235_v0  ;;  %1391 = vmatpush.msra.mxu2 %v3231_v27  ;;  %v386_v29 = vpop.f32.mrf.mxu2 }
 0x100   :  { %1496 = vmatpush.msra.mxu3 %v2307_v46  ;;  %v2606_v56 = vpop.f32.mrf.mxu1  ;;  %v3233_v46 = vand.u32 4294901760, %v2439_v2  ;;  %v282_v14 = vadd.f32 %v2288_v37, %v121_v36  ;;  %v153_v36 = vadd.f32 %v2600_v19, %v2358_v4 }
 0x101   :  { %1395 = vmatpush.msra.mxu2 %v3232_v31 }
 0x102   :  { %1498 = vmatpush.msra.mxu3 %v2328_v55  ;;  %v3234_v55 = vand.u32 4294901760, %v2460_v9  ;;  %v372_v37 = vadd.f32 %v2519_v50, %v282_v14  ;;  %v3238_v50 = vand.u32 4294901760, %v2548_v40 }
 0x103   :  { %736 = vmatmul.f32.gmra.mxu1 %v2235_v0  ;;  %1399 = vmatpush.msra.mxu2 %v3233_v46  ;;  %v129_v0 = vadd.f32 %v2600_v19, %v2295_v39 }
 0x104   :  { %1500 = vmatpush.msra.mxu3 %v2349_v1  ;;  %v2614_v45 = vpop.f32.mrf.mxu0  ;;  %v3235_v1 = vand.u32 4294901760, %v2481_v17 }
 0x105   :  { %1403 = vmatpush.msra.mxu2 %v3234_v55  ;;  %v286_v39 = vadd.f32 %v2309_v47, %v129_v0 }
 0x106   :  { %1502 = vmatpush.msra.mxu3 %v2370_v11  ;;  %v3236_v11 = vand.u32 4294901760, %v2502_v25  ;;  %v497_v25 = vpop.f32.mrf.mxu3 }
 0x107   :  { %655 = vmatmul.f32.gmra.mxu0 %v2243_v8  ;;  %1407 = vmatpush.msra.mxu2 %v3235_v1 }
 0x108   :  { %1504 = vmatpush.msra.mxu3 %v2391_v24  ;;  %v2627_v52 = vpop.f32.mrf.mxu1  ;;  %v3237_v24 = vand.u32 4294901760, %v2525_v41  ;;  %v377_v41 = vadd.f32 %v2570_v21, %v286_v39  ;;  %v161_v39 = vadd.f32 %v2600_v19, %v2379_v13 }
 0x109   :  { %1411 = vmatpush.msra.mxu2 %v3236_v11 }
 0x10a   :  { %1506 = vmatpush.msra.mxu3 %v2412_v44  ;;  %v474_v44 = vadd.f32 %v2538_v23, %v372_v37  ;;  %v298_v37 = vadd.f32 %v2372_v12, %v153_v36 }
 0x10b   :  { %740 = vmatmul.f32.gmra.mxu1 %v2243_v8  ;;  %1415 = vmatpush.msra.mxu2 %v3237_v24  ;;  %v137_v8 = vadd.f32 %v2600_v19, %v2316_v49 }
 0x10c   :  { %1508 = vmatpush.msra.mxu3 %v2433_v6  ;;  %v596_v2 = vpop.f32.mrf.mxu0  ;;  %v391_v6 = vpop.f32.mrf.mxu2 }
 0x10d   :  { %1419 = vmatpush.msra.mxu2 %v3238_v50  ;;  %v597_v10 = vadd.f32 %v596_v2, %v474_v44  ;;  %v392_v50 = vadd.f32 %v391_v6, %v298_v37 }
 0x10e   :  { %1510 = vmatpush.msra.mxu3 %v2454_v42  ;;  %v503_v16 = vpop.f32.mrf.mxu3 }
 0x10f   :  { %1423 = vmatpush.msra.mxu2 %v1033_v15  ;;  %v290_v15 = vadd.f32 %v2330_v57, %v137_v8 }
 0x110   :  { %1512 = vmatpush.msra.mxu3 %v2475_v35  ;;  %v681_v9 = vpop.f32.mrf.mxu1  ;;  %v480_v35 = vadd.f32 %v479_v43, %v377_v41  ;;  %v498_v41 = vadd.f32 %v497_v25, %v392_v50 }
 0x111   :  { %v682_v42 = vadd.f32 %v681_v9, %v597_v10  ;;  %v382_v33 = vadd.f32 %v381_v62, %v290_v15 }
 0x112   :  { %1514 = vmatpush.msra.mxu3 %v2496_v34 }
 0x113   :  { %v744_v47 = vmax.f32 %v682_v42, 0.0  ;;  %v486_v5 = vadd.f32 %v485_v18, %v382_v33  ;;  %v302_v42 = vadd.f32 %v2393_v26, %v161_v39 }
 0x114   :  { %1516 = vmatpush.msra.mxu3 %v2517_v60  ;;  %v600_v17 = vpop.f32.mrf.mxu0  ;;  %v145_v60 = vadd.f32 %v2600_v19, %v2337_v58 }
 0x115   :  { %v2652_v23 = vand.u32 4294901760, %v744_v47  ;;  %v601_v49 = vadd.f32 %v600_v17, %v480_v35 }
 0x116   :  { %1518 = vmatpush.msra.mxu3 %v2535_v22  ;;  %v396_v22 = vpop.f32.mrf.mxu2 }
 0x117   :  { %v813_v34 = vsub.f32 %v744_v47, %v2652_v23  ;;  %1038 = vmatmul.f32.vlgmr.msrb.gmra.mxu3 %v2652_v23 }
 0x118   :  { %1520 = vmatpush.msra.mxu3 %v2550_v30  ;;  %v685_v40 = vpop.f32.mrf.mxu1  ;;  %v294_v30 = vadd.f32 %v2351_v3, %v145_v60 }
 0x119   :  { %v814_v21 = vand.u32 4294901760, %v813_v34  ;;  %v686_v20 = vadd.f32 %v685_v40, %v601_v49  ;;  %1152 = vmatmul.f32.vlgmr.msra.gmra.mxu0 %v813_v34  ;;  %v397_v49 = vadd.f32 %v396_v22, %v302_v42 }
 0x11a   :  { %v387_v31 = vadd.f32 %v386_v29, %v294_v30  ;;  %v509_v29 = vpop.f32.mrf.mxu3 }
 0x11b   :  { %v745_v43 = vmax.f32 %v686_v20, 0.0  ;;  %1266 = vmatmul.f32.vlgmr.msra.gmra.mxu1 %v814_v21  ;;  %v815_v54 = vsub.f32 %v813_v34, %v814_v21  ;;  %v169_v34 = vadd.f32 %v2600_v19, %v2400_v32  ;;  %v504_v20 = vadd.f32 %v503_v16, %v397_v49 }
 0x11c   :  { %v604_v57 = vpop.f32.mrf.mxu0  ;;  %v492_v0 = vadd.f32 %v491_v59, %v387_v31 }
 0x11d   :  { %v2660_v48 = vand.u32 4294901760, %v745_v43  ;;  %v816_v38 = vand.u32 4294901760, %v815_v54  ;;  %v605_v27 = vadd.f32 %v604_v57, %v486_v5 }
 0x11e   :  { %v401_v1 = vpop.f32.mrf.mxu2 }
 0x11f   :  { %817 = vmatmul.f32.vlgmr.msrb.gmra.mxu2 %v816_v38  ;;  %1042 = vmatmul.f32.gmra.mxu3 %v2660_v48  ;;  %v821_v58 = vsub.f32 %v745_v43, %v2660_v48  ;;  %v306_v43 = vadd.f32 %v2414_v51, %v169_v34  ;;  %v177_v38 = vadd.f32 %v2600_v19, %v2421_v53 }
 0x120   :  { %v689_v62 = vpop.f32.mrf.mxu1 }
 0x121   :  { %v690_v46 = vadd.f32 %v689_v62, %v605_v27  ;;  %1157 = vmatmul.f32.gmra.mxu0 %v821_v58  ;;  %v822_v18 = vand.u32 4294901760, %v821_v58  ;;  %v402_v27 = vadd.f32 %v401_v1, %v306_v43 }
 0x122   :  { %v515_v60 = vpop.f32.mrf.mxu3 }
 0x123   :  { %v746_v14 = vmax.f32 %v690_v46, 0.0  ;;  %1272 = vmatmul.f32.gmra.mxu1 %v822_v18  ;;  %v823_v55 = vsub.f32 %v821_v58, %v822_v18  ;;  %v510_v46 = vadd.f32 %v509_v29, %v402_v27  ;;  %v310_v18 = vadd.f32 %v2435_v7, %v177_v38 }
 0x124   :  { %v608_v3 = vpop.f32.mrf.mxu0 }
 0x125   :  { %v2667_v11 = vand.u32 4294901760, %v746_v14  ;;  %v824_v2 = vand.u32 4294901760, %v823_v55  ;;  %v609_v24 = vadd.f32 %v608_v3, %v492_v0  ;;  %v3239_v0 = vld [vmem:[#allocation5_spill] sm:$0xff] }
 0x126   :  { %v406_v35 = vpop.f32.mrf.mxu2  ;;  %v185_v37 = vadd.f32 %v2600_v19, %v3239_v0 }
 0x127   :  { %825 = vmatmul.f32.gmra.mxu2 %v824_v2  ;;  %1046 = vmatmul.f32.gmra.mxu3 %v2667_v11  ;;  %v829_v4 = vsub.f32 %v746_v14, %v2667_v11  ;;  %v407_v2 = vadd.f32 %v406_v35, %v310_v18  ;;  %v3241_v35 = vld [vmem:[#allocation7_spill] sm:$0xff] }
 0x128   :  { %v693_v44 = vpop.f32.mrf.mxu1 }
 0x129   :  { %v694_v10 = vadd.f32 %v693_v44, %v609_v24  ;;  %1162 = vmatmul.f32.gmra.mxu0 %v829_v4  ;;  %v830_v59 = vand.u32 4294901760, %v829_v4  ;;  %v516_v50 = vadd.f32 %v515_v60, %v407_v2  ;;  %v3245_v2 = vld [vmem:[#allocation11_spill] sm:$0xff] }
 0x12a   :  { %v521_v31 = vpop.f32.mrf.mxu3 }
 0x12b   :  { %v747_v9 = vmax.f32 %v694_v10, 0.0  ;;  %1278 = vmatmul.f32.gmra.mxu1 %v830_v59  ;;  %v831_v8 = vsub.f32 %v829_v4, %v830_v59  ;;  %v3240_v10 = vld [vmem:[#allocation6_spill] sm:$0xff] }
 0x12c   :  { %v612_v12 = vpop.f32.mrf.mxu0  ;;  %v314_v59 = vadd.f32 %v3240_v10, %v185_v37 }
 0x12d   :  { %v2674_v47 = vand.u32 4294901760, %v747_v9  ;;  %v832_v17 = vand.u32 4294901760, %v831_v8  ;;  %v613_v15 = vadd.f32 %v612_v12, %v498_v41 }
 0x12e   :  { %v411_v22 = vpop.f32.mrf.mxu2 }
 0x12f   :  { %833 = vmatmul.f32.gmra.mxu2 %v832_v17  ;;  %1050 = vmatmul.f32.gmra.mxu3 %v2674_v47  ;;  %v837_v13 = vsub.f32 %v747_v9, %v2674_v47 }
 0x130   :  { %v697_v6 = vpop.f32.mrf.mxu1 }
 0x131   :  { %v698_v40 = vadd.f32 %v697_v6, %v613_v15  ;;  %1167 = vmatmul.f32.gmra.mxu0 %v837_v13  ;;  %v838_v25 = vand.u32 4294901760, %v837_v13  ;;  %v193_v15 = vadd.f32 %v2600_v19, %v3241_v35 }
 0x132   :  { %v527_v8 = vpop.f32.mrf.mxu3 }
 0x133   :  { %v748_v26 = vmax.f32 %v698_v40, 0.0  ;;  %1284 = vmatmul.f32.gmra.mxu1 %v838_v25  ;;  %v839_v21 = vsub.f32 %v837_v13, %v838_v25  ;;  %v412_v13 = vadd.f32 %v411_v22, %v314_v59 }
 0x134   :  { %v616_v33 = vpop.f32.mrf.mxu0 }
 0x135   :  { %v2681_v57 = vand.u32 4294901760, %v748_v26  ;;  %v840_v54 = vand.u32 4294901760, %v839_v21  ;;  %v617_v5 = vadd.f32 %v616_v33, %v504_v20  ;;  %v3242_v33 = vld [vmem:[#allocation8_spill] sm:$0xff] }
 0x136   :  { %v416_v29 = vpop.f32.mrf.mxu2  ;;  %v318_v21 = vadd.f32 %v3242_v33, %v193_v15 }
 0x137   :  { %841 = vmatmul.f32.gmra.mxu2 %v840_v54  ;;  %1054 = vmatmul.f32.gmra.mxu3 %v2681_v57  ;;  %v845_v32 = vsub.f32 %v748_v26, %v2681_v57  ;;  %v522_v26 = vadd.f32 %v521_v31, %v412_v13 }
 0x138   :  { %v701_v30 = vpop.f32.mrf.mxu1  ;;  %v417_v27 = vadd.f32 %v416_v29, %v318_v21 }
 0x139   :  { %v702_v58 = vadd.f32 %v701_v30, %v617_v5  ;;  %1172 = vmatmul.f32.gmra.mxu0 %v845_v32  ;;  %v846_v16 = vand.u32 4294901760, %v845_v32  ;;  %v3243_v30 = vld [vmem:[#allocation9_spill] sm:$0xff] }
 0x13a   :  { %v201_v38 = vadd.f32 %v2600_v19, %v3243_v30  ;;  %v528_v31 = vadd.f32 %v527_v8, %v417_v27 }
 0x13b   :  { %v749_v62 = vmax.f32 %v702_v58, 0.0  ;;  %1290 = vmatmul.f32.gmra.mxu1 %v846_v16  ;;  %v847_v36 = vsub.f32 %v845_v32, %v846_v16  ;;  %v533_v32 = vpop.f32.mrf.mxu3 }
 0x13c   :  { %v620_v51 = vpop.f32.mrf.mxu0 }
 0x13d   :  { %v2688_v14 = vand.u32 4294901760, %v749_v62  ;;  %v848_v3 = vand.u32 4294901760, %v847_v36  ;;  %v621_v55 = vadd.f32 %v620_v51, %v510_v46  ;;  %v3244_v46 = vld [vmem:[#allocation10_spill] sm:$0xff] }
 0x13e   :  { %v421_v60 = vpop.f32.mrf.mxu2  ;;  %v322_v18 = vadd.f32 %v3244_v46, %v201_v38 }
 0x13f   :  { %849 = vmatmul.f32.gmra.mxu2 %v848_v3  ;;  %1058 = vmatmul.f32.gmra.mxu3 %v2688_v14  ;;  %v853_v53 = vsub.f32 %v749_v62, %v2688_v14 }
 0x140   :  { %v705_v1 = vpop.f32.mrf.mxu1 }
 0x141   :  { %v706_v24 = vadd.f32 %v705_v1, %v621_v55  ;;  %1177 = vmatmul.f32.gmra.mxu0 %v853_v53  ;;  %v854_v4 = vand.u32 4294901760, %v853_v53 }
 0x143   :  { %v750_v44 = vmax.f32 %v706_v24, 0.0  ;;  %1296 = vmatmul.f32.gmra.mxu1 %v854_v4  ;;  %v855_v39 = vsub.f32 %v853_v53, %v854_v4  ;;  %v209_v24 = vadd.f32 %v2600_v19, %v3245_v2  ;;  %v422_v4 = vadd.f32 %v421_v60, %v322_v18 }
 0x144   :  { %v624_v7 = vpop.f32.mrf.mxu0 }
 0x145   :  { %v2695_v9 = vand.u32 4294901760, %v750_v44  ;;  %v856_v12 = vand.u32 4294901760, %v855_v39  ;;  %v625_v41 = vadd.f32 %v624_v7, %v516_v50  ;;  %v539_v7 = vpop.f32.mrf.mxu3  ;;  %v534_v59 = vadd.f32 %v533_v32, %v422_v4 }
 0x146   :  { %v426_v53 = vpop.f32.mrf.mxu2  ;;  %v233_v4 = vadd.f32 %v2600_v19, %v2591_v61 }
 0x147   :  { %857 = vmatmul.f32.gmra.mxu2 %v856_v12  ;;  %1062 = vmatmul.f32.gmra.mxu3 %v2695_v9  ;;  %v861_v42 = vsub.f32 %v750_v44, %v2695_v9  ;;  %v3246_v12 = vld [vmem:[#allocation12_spill] sm:$0xff] }
 0x148   :  { %v709_v17 = vpop.f32.mrf.mxu1  ;;  %v326_v8 = vadd.f32 %v3246_v12, %v209_v24  ;;  %v338_v12 = vadd.f32 %v2606_v56, %v233_v4 }
 0x149   :  { %v710_v6 = vadd.f32 %v709_v17, %v625_v41  ;;  %1182 = vmatmul.f32.gmra.mxu0 %v861_v42  ;;  %v862_v34 = vand.u32 4294901760, %v861_v42 }
 0x14b   :  { %v751_v49 = vmax.f32 %v710_v6, 0.0  ;;  %1302 = vmatmul.f32.gmra.mxu1 %v862_v34  ;;  %v863_v25 = vsub.f32 %v861_v42, %v862_v34  ;;  %v3247_v6 = vld [vmem:[#allocation13_spill] sm:$0xff] }
 0x14c   :  { %v628_v40 = vpop.f32.mrf.mxu0  ;;  %v217_v34 = vadd.f32 %v2600_v19, %v3247_v6 }
 0x14d   :  { %v2702_v20 = vand.u32 4294901760, %v751_v49  ;;  %v864_v43 = vand.u32 4294901760, %v863_v25  ;;  %v629_v54 = vadd.f32 %v628_v40, %v522_v26  ;;  %v545_v21 = vpop.f32.mrf.mxu3 }
 0x14e   :  { %v431_v15 = vpop.f32.mrf.mxu2 }
 0x14f   :  { %865 = vmatmul.f32.gmra.mxu2 %v864_v43  ;;  %1066 = vmatmul.f32.gmra.mxu3 %v2702_v20  ;;  %v869_v5 = vsub.f32 %v751_v49, %v2702_v20  ;;  %v427_v49 = vadd.f32 %v426_v53, %v326_v8 }
 0x150   :  { %v713_v22 = vpop.f32.mrf.mxu1 }
 0x151   :  { %v714_v58 = vadd.f32 %v713_v22, %v629_v54  ;;  %1187 = vmatmul.f32.gmra.mxu0 %v869_v5  ;;  %v870_v16 = vand.u32 4294901760, %v869_v5  ;;  %v540_v43 = vadd.f32 %v539_v7, %v427_v49  ;;  %v3248_v54 = vld [vmem:[#allocation14_spill] sm:$0xff] }
 0x153   :  { %v752_v62 = vmax.f32 %v714_v58, 0.0  ;;  %1308 = vmatmul.f32.gmra.mxu1 %v870_v16  ;;  %v871_v36 = vsub.f32 %v869_v5, %v870_v16  ;;  %v330_v5 = vadd.f32 %v3248_v54, %v217_v34  ;;  %v225_v58 = vadd.f32 %v2600_v19, %v2574_v63 }
 0x154   :  { %v632_v51 = vpop.f32.mrf.mxu0 }
 0x155   :  { %v2709_v3 = vand.u32 4294901760, %v752_v62  ;;  %v872_v55 = vand.u32 4294901760, %v871_v36  ;;  %v633_v0 = vadd.f32 %v632_v51, %v528_v31  ;;  %v432_v16 = vadd.f32 %v431_v15, %v330_v5 }
 0x156   :  { %v436_v36 = vpop.f32.mrf.mxu2  ;;  %v334_v53 = vadd.f32 %v2583_v28, %v225_v58 }
 0x157   :  { %v877_v1 = vsub.f32 %v752_v62, %v2709_v3  ;;  %873 = vmatmul.f32.gmra.mxu2 %v872_v55  ;;  %1070 = vmatmul.f32.gmra.mxu3 %v2709_v3  ;;  %v546_v55 = vadd.f32 %v545_v21, %v432_v16 }
 0x158   :  { %v717_v37 = vpop.f32.mrf.mxu1 }
 0x159   :  { %v718_v29 = vadd.f32 %v717_v37, %v633_v0  ;;  %1192 = vmatmul.f32.gmra.mxu0 %v877_v1  ;;  %v878_v44 = vand.u32 4294901760, %v877_v1  ;;  %v551_v37 = vpop.f32.mrf.mxu3 }
 0x15b   :  { %v753_v39 = vmax.f32 %v718_v29, 0.0  ;;  %1314 = vmatmul.f32.gmra.mxu1 %v878_v44  ;;  %v879_v10 = vsub.f32 %v877_v1, %v878_v44  ;;  %v437_v29 = vadd.f32 %v436_v36, %v334_v53 }
 0x15c   :  { %v636_v50 = vpop.f32.mrf.mxu0 }
 0x15d   :  { %v2716_v41 = vand.u32 4294901760, %v753_v39  ;;  %v880_v42 = vand.u32 4294901760, %v879_v10  ;;  %v637_v35 = vadd.f32 %v636_v50, %v534_v59  ;;  %v552_v59 = vadd.f32 %v551_v37, %v437_v29 }
 0x15e   :  { %v441_v10 = vpop.f32.mrf.mxu2 }
 0x15f   :  { %v885_v17 = vsub.f32 %v753_v39, %v2716_v41  ;;  %881 = vmatmul.f32.gmra.mxu2 %v880_v42  ;;  %1074 = vmatmul.f32.gmra.mxu3 %v2716_v41  ;;  %v442_v6 = vadd.f32 %v441_v10, %v338_v12 }
 0x160   :  { %v721_v13 = vpop.f32.mrf.mxu1 }
 0x161   :  { %v722_v40 = vadd.f32 %v721_v13, %v637_v35  ;;  %1197 = vmatmul.f32.gmra.mxu0 %v885_v17  ;;  %v886_v25 = vand.u32 4294901760, %v885_v17  ;;  %v557_v61 = vpop.f32.mrf.mxu3  ;;  %v241_v13 = vadd.f32 %v2600_v19, %v2614_v45 }
 0x163   :  { %v754_v60 = vmax.f32 %v722_v40, 0.0  ;;  %1320 = vmatmul.f32.gmra.mxu1 %v886_v25  ;;  %v887_v33 = vsub.f32 %v885_v17, %v886_v25 }
 0x164   :  { %v640_v26 = vpop.f32.mrf.mxu0 }
 0x165   :  { %v2723_v32 = vand.u32 4294901760, %v754_v60  ;;  %v888_v22 = vand.u32 4294901760, %v887_v33  ;;  %v641_v38 = vadd.f32 %v640_v26, %v540_v43  ;;  %v342_v26 = vadd.f32 %v2627_v52, %v241_v13 }
 0x166   :  { %v446_v43 = vpop.f32.mrf.mxu2 }
 0x167   :  { %v893_v30 = vsub.f32 %v754_v60, %v2723_v32  ;;  %889 = vmatmul.f32.gmra.mxu2 %v888_v22  ;;  %1078 = vmatmul.f32.gmra.mxu3 %v2723_v32  ;;  %v558_v60 = vadd.f32 %v557_v61, %v442_v6  ;;  %v447_v45 = vadd.f32 %v446_v43, %v342_v26 }
 0x168   :  { %v725_v27 = vpop.f32.mrf.mxu1 }
 0x169   :  { %v726_v62 = vadd.f32 %v725_v27, %v641_v38  ;;  %1202 = vmatmul.f32.gmra.mxu0 %v893_v30  ;;  %v894_v51 = vand.u32 4294901760, %v893_v30  ;;  %v563_v38 = vpop.f32.mrf.mxu3 }
 0x16a   :  { %v564_v16 = vadd.f32 %v563_v38, %v447_v45 }
 0x16b   :  { %v755_v31 = vmax.f32 %v726_v62, 0.0  ;;  %1326 = vmatmul.f32.gmra.mxu1 %v894_v51  ;;  %v895_v18 = vsub.f32 %v893_v30, %v894_v51 }
 0x16c   :  { %v644_v46 = vpop.f32.mrf.mxu0 }
 0x16d   :  { %v2730_v1 = vand.u32 4294901760, %v755_v31  ;;  %v896_v0 = vand.u32 4294901760, %v895_v18  ;;  %v645_v24 = vadd.f32 %v644_v46, %v546_v55 }
 0x16f   :  { %v901_v2 = vsub.f32 %v755_v31, %v2730_v1  ;;  %897 = vmatmul.f32.gmra.mxu2 %v896_v0  ;;  %1082 = vmatmul.f32.gmra.mxu3 %v2730_v1 }
 0x170   :  { %v729_v63 = vpop.f32.mrf.mxu1 }
 0x171   :  { %v730_v44 = vadd.f32 %v729_v63, %v645_v24  ;;  %1207 = vmatmul.f32.gmra.mxu0 %v901_v2  ;;  %v902_v7 = vand.u32 4294901760, %v901_v2 }
 0x173   :  { %v756_v39 = vmax.f32 %v730_v44, 0.0  ;;  %1332 = vmatmul.f32.gmra.mxu1 %v902_v7  ;;  %v903_v50 = vsub.f32 %v901_v2, %v902_v7  ;;  %v2762_v7 = vld [vmem:[%s3197_s4] ss:$0 sm:$0xff]  ;;  %s2055_s4 = smov [#allocation2]  }
 0x174   :  { %v648_v28 = vpop.f32.mrf.mxu0  ;;  %s1951_s12 = sshll.u32 %s2055_s4, 4  ;;  %s1952_s12 = int_to_ptr.vmem [resolvable:$true] %s1951_s12 }
 0x175   :  { %v2737_v8 = vand.u32 4294901760, %v756_v39  ;;  %v904_v42 = vand.u32 4294901760, %v903_v50  ;;  %v649_v35 = vadd.f32 %v648_v28, %v552_v59 }
 0x177   :  { %v909_v17 = vsub.f32 %v756_v39, %v2737_v8  ;;  %905 = vmatmul.f32.gmra.mxu2 %v904_v42  ;;  %1086 = vmatmul.f32.gmra.mxu3 %v2737_v8 }
 0x178   :  { %v733_v15 = vpop.f32.mrf.mxu1 }
 0x179   :  { %v734_v34 = vadd.f32 %v733_v15, %v649_v35  ;;  %1212 = vmatmul.f32.gmra.mxu0 %v909_v17  ;;  %v910_v49 = vand.u32 4294901760, %v909_v17 }
 0x17b   :  { %v757_v40 = vmax.f32 %v734_v34, 0.0  ;;  %1338 = vmatmul.f32.gmra.mxu1 %v910_v49  ;;  %v911_v25 = vsub.f32 %v909_v17, %v910_v49 }
 0x17c   :  { %v652_v56 = vpop.f32.mrf.mxu0 }
 0x17d   :  { %v2744_v33 = vand.u32 4294901760, %v757_v40  ;;  %v912_v21 = vand.u32 4294901760, %v911_v25  ;;  %v653_v5 = vadd.f32 %v652_v56, %v558_v60 }
 0x17f   :  { %v917_v54 = vsub.f32 %v757_v40, %v2744_v33  ;;  %913 = vmatmul.f32.gmra.mxu2 %v912_v21  ;;  %1090 = vmatmul.f32.gmra.mxu3 %v2744_v33 }
 0x180   :  { %v737_v19 = vpop.f32.mrf.mxu1 }
 0x181   :  { %v738_v22 = vadd.f32 %v737_v19, %v653_v5  ;;  %1217 = vmatmul.f32.gmra.mxu0 %v917_v54  ;;  %v918_v30 = vand.u32 4294901760, %v917_v54 }
 0x183   :  { %v758_v27 = vmax.f32 %v738_v22, 0.0  ;;  %1344 = vmatmul.f32.gmra.mxu1 %v918_v30  ;;  %v919_v58 = vsub.f32 %v917_v54, %v918_v30 }
 0x184   :  { %v656_v52 = vpop.f32.mrf.mxu0 }
 0x185   :  { %v2748_v62 = vand.u32 4294901760, %v758_v27  ;;  %v920_v51 = vand.u32 4294901760, %v919_v58  ;;  %v657_v31 = vadd.f32 %v656_v52, %v564_v16 }
 0x187   :  { %v925_v36 = vsub.f32 %v758_v27, %v2748_v62  ;;  %921 = vmatmul.f32.gmra.mxu2 %v920_v51  ;;  %1094 = vmatmul.f32.gmra.mxu3 %v2748_v62 }
 0x188   :  { %v741_v46 = vpop.f32.mrf.mxu1 }
 0x189   :  { %v742_v18 = vadd.f32 %v741_v46, %v657_v31  ;;  %1222 = vmatmul.f32.gmra.mxu0 %v925_v36  ;;  %v926_v55 = vand.u32 4294901760, %v925_v36 }
 0x18b   :  { %v759_v53 = vmax.f32 %v742_v18, 0.0  ;;  %1350 = vmatmul.f32.gmra.mxu1 %v926_v55  ;;  %v927_v0 = vsub.f32 %v925_v36, %v926_v55 }
 0x18d   :  { %v2752_v37 = vand.u32 4294901760, %v759_v53  ;;  %v928_v2 = vand.u32 4294901760, %v927_v0 }
 0x18f   :  { %v933_v24 = vsub.f32 %v759_v53, %v2752_v37  ;;  %929 = vmatmul.f32.gmra.mxu2 %v928_v2  ;;  %1098 = vmatmul.f32.gmra.mxu3 %v2752_v37 }
 0x191   :  { %1227 = vmatmul.f32.gmra.mxu0 %v933_v24  ;;  %v934_v63 = vand.u32 4294901760, %v933_v24 }
 0x193   :  { %1356 = vmatmul.f32.gmra.mxu1 %v934_v63  ;;  %v935_v4 = vsub.f32 %v933_v24, %v934_v63 }
 0x195   :  { %v936_v29 = vand.u32 4294901760, %v935_v4 }
 0x196   :  { %v1153_v18 = vpop.f32.mrf.mxu0 }
 0x197   :  { %937 = vmatmul.f32.gmra.mxu2 %v936_v29  ;;  %1522 = vmatmul.f32.vlgmr.msra.gmra.mxu3 %v2652_v23 }
 0x19a   :  { %v1039_v44 = vpop.f32.mrf.mxu3 }
 0x19f   :  { %1425 = vmatmul.f32.vlgmr.msra.gmra.mxu2 %v2652_v23  ;;  %1526 = vmatmul.f32.gmra.mxu3 %v2660_v48 }
 0x1a2   :  { %v818_v39 = vpop.f32.mrf.mxu2  ;;  %v1043_v28 = vpop.f32.mrf.mxu3 }
 0x1a3   :  { %v819_v50 = vadd.f32 %v2762_v7, %v818_v39 }
 0x1a5   :  { %v2765_v10 = vadd.f32 %v1039_v44, %v819_v50 }
 0x1a7   :  { %1429 = vmatmul.f32.gmra.mxu2 %v2660_v48  ;;  %1530 = vmatmul.f32.gmra.mxu3 %v2667_v11 }
 0x1aa   :  { %v826_v59 = vpop.f32.mrf.mxu2  ;;  %v1047_v12 = vpop.f32.mrf.mxu3 }
 0x1ab   :  { %v827_v23 = vadd.f32 %v2762_v7, %v826_v59 }
 0x1ad   :  { %v2770_v42 = vadd.f32 %v1043_v28, %v827_v23 }
 0x1af   :  { %1433 = vmatmul.f32.gmra.mxu2 %v2667_v11  ;;  %1534 = vmatmul.f32.gmra.mxu3 %v2674_v47 }
 0x1b2   :  { %v834_v17 = vpop.f32.mrf.mxu2  ;;  %v1051_v35 = vpop.f32.mrf.mxu3 }
 0x1b3   :  { %v835_v61 = vadd.f32 %v2762_v7, %v834_v17 }
 0x1b5   :  { %v2775_v15 = vadd.f32 %v1047_v12, %v835_v61 }
 0x1b7   :  { %1437 = vmatmul.f32.gmra.mxu2 %v2674_v47  ;;  %1538 = vmatmul.f32.gmra.mxu3 %v2681_v57 }
 0x1ba   :  { %v842_v48 = vpop.f32.mrf.mxu2  ;;  %v1055_v13 = vpop.f32.mrf.mxu3 }
 0x1bb   :  { %v843_v6 = vadd.f32 %v2762_v7, %v842_v48  ;;  %v1586_v48 = vlaneseq }
 0x1bd   :  { %v2780_v34 = vadd.f32 %v1051_v35, %v843_v6 }
 0x1bf   :  { %1441 = vmatmul.f32.gmra.mxu2 %v2681_v57  ;;  %1542 = vmatmul.f32.gmra.mxu3 %v2688_v14 }
 0x1c2   :  { %v850_v11 = vpop.f32.mrf.mxu2  ;;  %v1059_v49 = vpop.f32.mrf.mxu3 }
 0x1c3   :  { %v851_v40 = vadd.f32 %v2762_v7, %v850_v11  ;;  %v2842_v11 = vand.u32 127, %v1586_v48 }
 0x1c5   :  { %v2785_v56 = vadd.f32 %v1055_v13, %v851_v40  ;;  %vm1589_vm1 = vcmp.ge.s32.totalorder %v2842_v11, 3  ;;  %vm1590_vm2 = vcmp.lt.s32.totalorder %v2842_v11, 7  ;;  %vm1588_vm11 = vcmp.lt.s32.totalorder %v2842_v11, 3 }
 0x1c6   :  { %vm2849_vm3 = vmand %vm1589_vm1, %vm1590_vm2 }
 0x1c7   :  { %1445 = vmatmul.f32.gmra.mxu2 %v2688_v14  ;;  %1546 = vmatmul.f32.gmra.mxu3 %v2695_v9 }
 0x1ca   :  { %v858_v47 = vpop.f32.mrf.mxu2  ;;  %v1063_v25 = vpop.f32.mrf.mxu3 }
 0x1cb   :  { %v859_v60 = vadd.f32 %v2762_v7, %v858_v47 }
 0x1cd   :  { %v2790_v26 = vadd.f32 %v1059_v49, %v859_v60 }
 0x1cf   :  { %1449 = vmatmul.f32.gmra.mxu2 %v2695_v9  ;;  %1550 = vmatmul.f32.gmra.mxu3 %v2702_v20 }
 0x1d2   :  { %v866_v57 = vpop.f32.mrf.mxu2  ;;  %v1067_v21 = vpop.f32.mrf.mxu3 }
 0x1d3   :  { %v867_v43 = vadd.f32 %v2762_v7, %v866_v57 }
 0x1d5   :  { %v2795_v54 = vadd.f32 %v1063_v25, %v867_v43 }
 0x1d7   :  { %1453 = vmatmul.f32.gmra.mxu2 %v2702_v20  ;;  %1554 = vmatmul.f32.gmra.mxu3 %v2709_v3 }
 0x1da   :  { %v874_v14 = vpop.f32.mrf.mxu2  ;;  %v1071_v5 = vpop.f32.mrf.mxu3 }
 0x1db   :  { %v875_v19 = vadd.f32 %v2762_v7, %v874_v14 }
 0x1dd   :  { %v2800_v45 = vadd.f32 %v1067_v21, %v875_v19 }
 0x1df   :  { %1457 = vmatmul.f32.gmra.mxu2 %v2709_v3  ;;  %1558 = vmatmul.f32.gmra.mxu3 %v2716_v41 }
 0x1e2   :  { %v882_v9 = vpop.f32.mrf.mxu2  ;;  %v1075_v22 = vpop.f32.mrf.mxu3 }
 0x1e3   :  { %v883_v30 = vadd.f32 %v2762_v7, %v882_v9 }
 0x1e5   :  { %v2805_v38 = vadd.f32 %v1071_v5, %v883_v30 }
 0x1e7   :  { %1461 = vmatmul.f32.gmra.mxu2 %v2716_v41  ;;  %1562 = vmatmul.f32.gmra.mxu3 %v2723_v32 }
 0x1ea   :  { %v890_v20 = vpop.f32.mrf.mxu2  ;;  %v1079_v27 = vpop.f32.mrf.mxu3 }
 0x1eb   :  { %v891_v58 = vadd.f32 %v2762_v7, %v890_v20 }
 0x1ed   :  { %v2810_v52 = vadd.f32 %v1075_v22, %v891_v58 }
 0x1ef   :  { %1465 = vmatmul.f32.gmra.mxu2 %v2723_v32  ;;  %1566 = vmatmul.f32.gmra.mxu3 %v2730_v1  ;;  %v1267_v32 = vpop.f32.mrf.mxu1 }
 0x1f2   :  { %v898_v3 = vpop.f32.mrf.mxu2  ;;  %v1083_v16 = vpop.f32.mrf.mxu3 }
 0x1f3   :  { %v899_v51 = vadd.f32 %v2762_v7, %v898_v3 }
 0x1f5   :  { %v2815_v36 = vadd.f32 %v1079_v27, %v899_v51 }
 0x1f7   :  { %1469 = vmatmul.f32.gmra.mxu2 %v2730_v1  ;;  %1570 = vmatmul.f32.gmra.mxu3 %v2737_v8  ;;  %v1158_v1 = vpop.f32.mrf.mxu0  ;;  %v1273_v29 = vpop.f32.mrf.mxu1 }
 0x1fa   :  { %v906_v41 = vpop.f32.mrf.mxu2  ;;  %v1087_v31 = vpop.f32.mrf.mxu3 }
 0x1fb   :  { %v907_v46 = vadd.f32 %v2762_v7, %v906_v41 }
 0x1fd   :  { %v2820_v55 = vadd.f32 %v1083_v16, %v907_v46 }
 0x1ff   :  { %1473 = vmatmul.f32.gmra.mxu2 %v2737_v8  ;;  %1574 = vmatmul.f32.gmra.mxu3 %v2744_v33  ;;  %v1163_v39 = vpop.f32.mrf.mxu0  ;;  %v1279_v12 = vpop.f32.mrf.mxu1 }
 0x200   :  { %v1164_v30 = vadd.f32 %v1163_v39, %v2775_v15 }
 0x202   :  { %v914_v53 = vpop.f32.mrf.mxu2  ;;  %v1091_v0 = vpop.f32.mrf.mxu3  ;;  %v1280_v58 = vadd.f32 %v1279_v12, %v1164_v30 }
 0x203   :  { %v915_v2 = vadd.f32 %v2762_v7, %v914_v53 }
 0x205   :  { %v2825_v24 = vadd.f32 %v1087_v31, %v915_v2 }
 0x207   :  { %1477 = vmatmul.f32.gmra.mxu2 %v2744_v33  ;;  %1578 = vmatmul.f32.gmra.mxu3 %v2748_v62  ;;  %v1168_v35 = vpop.f32.mrf.mxu0  ;;  %v1285_v6 = vpop.f32.mrf.mxu1 }
 0x20a   :  { %v922_v63 = vpop.f32.mrf.mxu2  ;;  %v1095_v4 = vpop.f32.mrf.mxu3 }
 0x20b   :  { %v923_v44 = vadd.f32 %v2762_v7, %v922_v63 }
 0x20d   :  { %v2830_v8 = vadd.f32 %v1091_v0, %v923_v44 }
 0x20f   :  { %1481 = vmatmul.f32.gmra.mxu2 %v2748_v62  ;;  %1582 = vmatmul.f32.gmra.mxu3 %v2752_v37  ;;  %v1154_v62 = vadd.f32 %v1153_v18, %v2765_v10  ;;  %v1291_v21 = vpop.f32.mrf.mxu1 }
 0x211   :  { %v1268_v49 = vadd.f32 %v1267_v32, %v1154_v62  ;;  %v1169_v32 = vadd.f32 %v1168_v35, %v2780_v34 }
 0x212   :  { %v930_v28 = vpop.f32.mrf.mxu2  ;;  %v1099_v50 = vpop.f32.mrf.mxu3 }
 0x213   :  { %v931_v59 = vadd.f32 %v2762_v7, %v930_v28  ;;  %v1286_v0 = vadd.f32 %v1285_v6, %v1169_v32 }
 0x215   :  { %v2835_v33 = vadd.f32 %v1095_v4, %v931_v59 }
 0x217   :  { %1485 = vmatmul.f32.gmra.mxu2 %v2752_v37  ;;  %v1173_v37 = vpop.f32.mrf.mxu0  ;;  %v1297_v31 = vpop.f32.mrf.mxu1 }
 0x218   :  { %v1174_v28 = vadd.f32 %v1173_v37, %v2785_v56 }
 0x21a   :  { %v938_v23 = vpop.f32.mrf.mxu2  ;;  %v1523_v17 = vpop.f32.mrf.mxu3 }
 0x21b   :  { %v939_v61 = vadd.f32 %v2762_v7, %v938_v23  ;;  %v1159_v7 = vadd.f32 %v1158_v1, %v2770_v42 }
 0x21d   :  { %v2839_v13 = vadd.f32 %v1099_v50, %v939_v61  ;;  %v1274_v43 = vadd.f32 %v1273_v29, %v1159_v7  ;;  %v1292_v50 = vadd.f32 %v1291_v21, %v1174_v28 }
 0x21f   :  { %v1178_v20 = vpop.f32.mrf.mxu0  ;;  %v1303_v44 = vpop.f32.mrf.mxu1 }
 0x220   :  { %v1179_v62 = vadd.f32 %v1178_v20, %v2790_v26 }
 0x222   :  { %v1426_v40 = vpop.f32.mrf.mxu2  ;;  %v1527_v47 = vpop.f32.mrf.mxu3 }
 0x223   :  { %v1427_v25 = vadd.f32 %v1426_v40, %v1268_v49  ;;  %v1298_v49 = vadd.f32 %v1297_v31, %v1179_v62 }
 0x225   :  { %v2846_v60 = vadd.f32 %v1523_v17, %v1427_v25 }
 0x227   :  { %v1608_v10 = vmul.f32 %v2846_v60, %v2846_v60  ;;  %v1183_v53 = vpop.f32.mrf.mxu0  ;;  %v1309_v6 = vpop.f32.mrf.mxu1 }
 0x229   :  { %v1624_v14 = vsel %vm2849_vm3, %v1608_v10, 0.0 }
 0x22a   :  { %v1430_v5 = vpop.f32.mrf.mxu2  ;;  %v1531_v19 = vpop.f32.mrf.mxu3  ;;  %v1641_v9 = vsel %vm1640_vm4, %v1624_v14, 0.0 }
 0x22b   :  { %v1431_v22 = vadd.f32 %v1430_v5, %v1274_v43  ;;  %1642 = vadd.xlane.f32.xlu0 %v1641_v9  ;;  %v1184_v43 = vadd.f32 %v1183_v53, %v2795_v54 }
 0x22d   :  { %v2858_v42 = vadd.f32 %v1527_v47, %v1431_v22  ;;  %v1304_v5 = vadd.f32 %v1303_v44, %v1184_v43 }
 0x22f   :  { %v1609_v27 = vmul.f32 %v2858_v42, %v2858_v42  ;;  %v1188_v35 = vpop.f32.mrf.mxu0  ;;  %v1315_v14 = vpop.f32.mrf.mxu1 }
 0x231   :  { %v1625_v3 = vsel %vm2849_vm3, %v1609_v27, 0.0 }
 0x232   :  { %v1434_v16 = vpop.f32.mrf.mxu2  ;;  %v1535_v51 = vpop.f32.mrf.mxu3  ;;  %v1644_v41 = vsel %vm1640_vm4, %v1625_v3, 0.0 }
 0x233   :  { %v1435_v46 = vadd.f32 %v1434_v16, %v1280_v58  ;;  %1645 = vadd.xlane.f32.xlu0 %v1644_v41  ;;  %v1189_v58 = vadd.f32 %v1188_v35, %v2800_v45 }
 0x235   :  { %v2866_v18 = vadd.f32 %v1531_v19, %v1435_v46  ;;  %v1310_v16 = vadd.f32 %v1309_v6, %v1189_v58 }
 0x237   :  { %v1610_v15 = vmul.f32 %v2866_v18, %v2866_v18  ;;  %v1193_v10 = vpop.f32.mrf.mxu0 }
 0x239   :  { %v1626_v2 = vsel %vm2849_vm3, %v1610_v15, 0.0  ;;  %v1321_v15 = vpop.f32.mrf.mxu1 }
 0x23a   :  { %v1438_v1 = vpop.f32.mrf.mxu2  ;;  %v1539_v63 = vpop.f32.mrf.mxu3  ;;  %v1647_v4 = vsel %vm1640_vm4, %v1626_v2, 0.0 }
 0x23b   :  { %v1439_v29 = vadd.f32 %v1438_v1, %v1286_v0  ;;  %1648 = vadd.xlane.f32.xlu1 %v1647_v4  ;;  %v1194_v0 = vadd.f32 %v1193_v10, %v2805_v38 }
 0x23d   :  { %v2874_v39 = vadd.f32 %v1535_v51, %v1439_v29  ;;  %v1316_v1 = vadd.f32 %v1315_v14, %v1194_v0 }
 0x23f   :  { %v1611_v34 = vmul.f32 %v2874_v39, %v2874_v39  ;;  %v1198_v3 = vpop.f32.mrf.mxu0 }
 0x241   :  { %v1627_v59 = vsel %vm2849_vm3, %v1611_v34, 0.0 }
 0x242   :  { %v1442_v12 = vpop.f32.mrf.mxu2  ;;  %v1543_v23 = vpop.f32.mrf.mxu3  ;;  %v1650_v17 = vsel %vm1640_vm4, %v1627_v59, 0.0 }
 0x243   :  { %v1443_v61 = vadd.f32 %v1442_v12, %v1292_v50  ;;  %1651 = vadd.xlane.f32.xlu1 %v1650_v17  ;;  %v1199_v50 = vadd.f32 %v1198_v3, %v2810_v52  ;;  %v1327_v59 = vpop.f32.mrf.mxu1 }
 0x245   :  { %v2882_v48 = vadd.f32 %v1539_v63, %v1443_v61  ;;  %v1322_v12 = vadd.f32 %v1321_v15, %v1199_v50 }
 0x247   :  { %v1612_v56 = vmul.f32 %v2882_v48, %v2882_v48  ;;  %v1203_v2 = vpop.f32.mrf.mxu0 }
 0x249   :  { %v1628_v40 = vsel %vm2849_vm3, %v1612_v56, 0.0 }
 0x24a   :  { %v1446_v47 = vpop.f32.mrf.mxu2  ;;  %v1547_v25 = vpop.f32.mrf.mxu3  ;;  %v1653_v37 = vsel %vm1640_vm4, %v1628_v40, 0.0 }
 0x24b   :  { %v1447_v7 = vadd.f32 %v1446_v47, %v1298_v49  ;;  %1654 = vadd.xlane.f32.xlu2 %v1653_v37  ;;  %v1204_v49 = vadd.f32 %v1203_v2, %v2815_v36  ;;  %v1333_v40 = vpop.f32.mrf.mxu1 }
 0x24d   :  { %v2890_v21 = vadd.f32 %v1543_v23, %v1447_v7  ;;  %v1328_v47 = vadd.f32 %v1327_v59, %v1204_v49 }
 0x24f   :  { %v1613_v26 = vmul.f32 %v2890_v21, %v2890_v21  ;;  %v1208_v6 = vpop.f32.mrf.mxu0 }
 0x250   :  { %v1209_v14 = vadd.f32 %v1208_v6, %v2820_v55 }
 0x251   :  { %v1629_v19 = vsel %vm2849_vm3, %v1613_v26, 0.0 }
 0x252   :  { %v1450_v9 = vpop.f32.mrf.mxu2  ;;  %v1551_v22 = vpop.f32.mrf.mxu3  ;;  %v1656_v30 = vsel %vm1640_vm4, %v1629_v19, 0.0  ;;  %v1334_v19 = vadd.f32 %v1333_v40, %v1209_v14 }
 0x253   :  { %v1451_v20 = vadd.f32 %v1450_v9, %v1304_v5  ;;  %1657 = vadd.xlane.f32.xlu2 %v1656_v30 }
 0x255   :  { %v2898_v27 = vadd.f32 %v1547_v25, %v1451_v20 }
 0x257   :  { %v1614_v54 = vmul.f32 %v2898_v27, %v2898_v27  ;;  %v1213_v5 = vpop.f32.mrf.mxu0 }
 0x259   :  { %v1630_v51 = vsel %vm2849_vm3, %v1614_v54, 0.0  ;;  %v1214_v54 = vadd.f32 %v1213_v5, %v2825_v24 }
 0x25a   :  { %v1454_v41 = vpop.f32.mrf.mxu2  ;;  %v1555_v31 = vpop.f32.mrf.mxu3  ;;  %v1659_v46 = vsel %vm1640_vm4, %v1630_v51, 0.0 }
 0x25b   :  { %v1455_v32 = vadd.f32 %v1454_v41, %v1310_v16  ;;  %1660 = vadd.xlane.f32.xlu0 %v1659_v46 }
 0x25d   :  { %v2906_v53 = vadd.f32 %v1551_v22, %v1455_v32  ;;  %v1339_v22 = vpop.f32.mrf.mxu1 }
 0x25e   :  { %v1340_v41 = vadd.f32 %v1339_v22, %v1214_v54 }
 0x25f   :  { %v1615_v45 = vmul.f32 %v2906_v53, %v2906_v53  ;;  %v1218_v51 = vpop.f32.mrf.mxu0 }
 0x260   :  { %v1219_v2 = vadd.f32 %v1218_v51, %v2830_v8 }
 0x261   :  { %v1631_v63 = vsel %vm2849_vm3, %v1615_v45, 0.0 }
 0x262   :  { %v1458_v4 = vpop.f32.mrf.mxu2  ;;  %v1559_v29 = vpop.f32.mrf.mxu3  ;;  %v1662_v44 = vsel %vm1640_vm4, %v1631_v63, 0.0 }
 0x263   :  { %v1459_v28 = vadd.f32 %v1458_v4, %v1316_v1  ;;  %1663 = vadd.xlane.f32.xlu1 %v1662_v44 }
 0x265   :  { %v2914_v34 = vadd.f32 %v1555_v31, %v1459_v28  ;;  %v1345_v0 = vpop.f32.mrf.mxu1 }
 0x266   :  { %v1346_v63 = vadd.f32 %v1345_v0, %v1219_v2 }
 0x267   :  { %v1616_v38 = vmul.f32 %v2914_v34, %v2914_v34 }
 0x269   :  { %v1632_v23 = vsel %vm2849_vm3, %v1616_v38, 0.0 }
 0x26a   :  { %v1462_v17 = vpop.f32.mrf.mxu2  ;;  %v1563_v35 = vpop.f32.mrf.mxu3  ;;  %v1665_v61 = vsel %vm1640_vm4, %v1632_v23, 0.0 }
 0x26b   :  { %v1463_v62 = vadd.f32 %v1462_v17, %v1322_v12  ;;  %1666 = vadd.xlane.f32.xlu2 %v1665_v61 }
 0x26d   :  { %v2922_v56 = vadd.f32 %v1559_v29, %v1463_v62  ;;  %v1223_v29 = vpop.f32.mrf.mxu0  ;;  %v1351_v12 = vpop.f32.mrf.mxu1 }
 0x26e   :  { %v1224_v38 = vadd.f32 %v1223_v29, %v2835_v33 }
 0x26f   :  { %v1617_v52 = vmul.f32 %v2922_v56, %v2922_v56 }
 0x270   :  { %v1352_v23 = vadd.f32 %v1351_v12, %v1224_v38 }
 0x271   :  { %v1633_v25 = vsel %vm2849_vm3, %v1617_v52, 0.0 }
 0x272   :  { %v1466_v37 = vpop.f32.mrf.mxu2  ;;  %v1668_v7 = vsel %vm1640_vm4, %v1633_v25, 0.0  ;;  %v1567_v43 = vpop.f32.mrf.mxu3 }
 0x273   :  { %v1467_v10 = vadd.f32 %v1466_v37, %v1328_v47  ;;  %1669 = vadd.xlane.f32.xlu0 %v1668_v7 }
 0x275   :  { %v2930_v26 = vadd.f32 %v1563_v35, %v1467_v10  ;;  %v1228_v49 = vpop.f32.mrf.mxu0  ;;  %v1357_v47 = vpop.f32.mrf.mxu1 }
 0x276   :  { %v1229_v40 = vadd.f32 %v1228_v49, %v2839_v13 }
 0x277   :  { %v1618_v36 = vmul.f32 %v2930_v26, %v2930_v26 }
 0x278   :  { %v1358_v25 = vadd.f32 %v1357_v47, %v1229_v40 }
 0x279   :  { %v1634_v9 = vsel %vm2849_vm3, %v1618_v36, 0.0 }
 0x27a   :  { %v1470_v30 = vpop.f32.mrf.mxu2  ;;  %v1671_v20 = vsel %vm1640_vm4, %v1634_v9, 0.0  ;;  %v1571_v16 = vpop.f32.mrf.mxu3 }
 0x27b   :  { %v1471_v58 = vadd.f32 %v1470_v30, %v1334_v19  ;;  %1672 = vadd.xlane.f32.xlu1 %v1671_v20 }
 0x27d   :  { %v2938_v3 = vadd.f32 %v1567_v43, %v1471_v58 }
 0x27f   :  { %v1619_v55 = vmul.f32 %v2938_v3, %v2938_v3 }
 0x281   :  { %v1635_v31 = vsel %vm2849_vm3, %v1619_v55, 0.0 }
 0x282   :  { %v1474_v46 = vpop.f32.mrf.mxu2  ;;  %v1674_v32 = vsel %vm1640_vm4, %v1635_v31, 0.0  ;;  %v1575_v1 = vpop.f32.mrf.mxu3 }
 0x283   :  { %v1475_v15 = vadd.f32 %v1474_v46, %v1340_v41  ;;  %1675 = vadd.xlane.f32.xlu2 %v1674_v32 }
 0x285   :  { %v2946_v45 = vadd.f32 %v1571_v16, %v1475_v15 }
 0x287   :  { %v1620_v24 = vmul.f32 %v2946_v45, %v2946_v45 }
 0x289   :  { %v1636_v4 = vsel %vm2849_vm3, %v1620_v24, 0.0 }
 0x28a   :  { %v1478_v44 = vpop.f32.mrf.mxu2  ;;  %v1677_v28 = vsel %vm1640_vm4, %v1636_v4, 0.0  ;;  %v1579_v35 = vpop.f32.mrf.mxu3 }
 0x28b   :  { %v1479_v50 = vadd.f32 %v1478_v44, %v1346_v63  ;;  %1678 = vadd.xlane.f32.xlu0 %v1677_v28 }
 0x28d   :  { %v2954_v59 = vadd.f32 %v1575_v1, %v1479_v50 }
 0x28f   :  { %v1621_v8 = vmul.f32 %v2954_v59, %v2954_v59 }
 0x291   :  { %v1637_v17 = vsel %vm2849_vm3, %v1621_v8, 0.0 }
 0x292   :  { %v1482_v61 = vpop.f32.mrf.mxu2  ;;  %v1680_v62 = vsel %vm1640_vm4, %v1637_v17, 0.0  ;;  %v1583_v14 = vpop.f32.mrf.mxu3 }
 0x293   :  { %v1483_v6 = vadd.f32 %v1482_v61, %v1352_v23  ;;  %1681 = vadd.xlane.f32.xlu1 %v1680_v62 }
 0x295   :  { %v2962_v52 = vadd.f32 %v1579_v35, %v1483_v6 }
 0x297   :  { %v1622_v33 = vmul.f32 %v2962_v52, %v2962_v52 }
 0x299   :  { %v1638_v37 = vsel %vm2849_vm3, %v1622_v33, 0.0 }
 0x29a   :  { %v1486_v7 = vpop.f32.mrf.mxu2  ;;  %v1683_v10 = vsel %vm1640_vm4, %v1638_v37, 0.0 }
 0x29b   :  { %v1487_v43 = vadd.f32 %v1486_v7, %v1358_v25  ;;  %1684 = vadd.xlane.f32.xlu2 %v1683_v10 }
 0x29d   :  { %v2970_v5 = vadd.f32 %v1583_v14, %v1487_v43 }
 0x29e   :  { %v1643_v36 = vpop.xlane.xlu0 %1642 }
 0x29f   :  { %v1623_v13 = vmul.f32 %v2970_v5, %v2970_v5  ;;  %v1689_v19 = vadd.f32 1e-12, %v1643_v36 }
 0x2a1   :  { %v1639_v9 = vsel %vm2849_vm3, %v1623_v13, 0.0  ;;  %1965 = vrsqrt.f32 %v1689_v19  ;;  %vm1711_vm6 = vweird.f32 %v1689_v19 }
 0x2a2   :  { %v1686_v22 = vsel %vm1640_vm4, %v1639_v9, 0.0 }
 0x2a3   :  { %1687 = vadd.xlane.f32.xlu0 %v1686_v22 }
 0x2a6   :  { %v1646_v30 = vpop.xlane.xlu0 %1645 }
 0x2a7   :  { %v1690_v20 = vadd.f32 1e-12, %v1646_v30  ;;  %v1966_v58 = vpop.eup %1965 }
 0x2a8   :  { %v1706_v54 = vmul.f32 %v1966_v58, %v1689_v19  ;;  %vm1712_vm5 = vweird.f32 %v1966_v58 }
 0x2a9   :  { %1967 = vrsqrt.f32 %v1690_v20  ;;  %vm1713_vm7 = vmor %vm1711_vm6, %vm1712_vm5  ;;  %vm1721_vm9 = vweird.f32 %v1690_v20 }
 0x2aa   :  { %v1707_v51 = vmul.f32 %v1966_v58, %v1706_v54 }
 0x2ac   :  { %v1708_v31 = vmul.f32 0.5, %v1707_v51 }
 0x2ae   :  { %v1649_v16 = vpop.xlane.xlu1 %1648  ;;  %v1709_v0 = vsub.f32 1.5, %v1708_v31 }
 0x2af   :  { %v1691_v55 = vadd.f32 1e-12, %v1649_v16  ;;  %v1968_v41 = vpop.eup %1967 }
 0x2b0   :  { %v1716_v46 = vmul.f32 %v1968_v41, %v1690_v20  ;;  %v1710_v1 = vmul.f32 %v1966_v58, %v1709_v0  ;;  %vm1722_vm8 = vweird.f32 %v1968_v41 }
 0x2b1   :  { %1969 = vrsqrt.f32 %v1691_v55  ;;  %vm1723_vm10 = vmor %vm1721_vm9, %vm1722_vm8  ;;  %vm1731_vm13 = vweird.f32 %v1691_v55 }
 0x2b2   :  { %v1717_v2 = vmul.f32 %v1968_v41, %v1716_v46  ;;  %v1714_v38 = vsel %vm1713_vm7, %v1966_v58, %v1710_v1 }
 0x2b3   :  { %v1865_v8 = vmul.f32 %v1714_v38, %v2846_v60 }
 0x2b4   :  { %v1718_v63 = vmul.f32 0.5, %v1717_v2 }
 0x2b5   :  { %v1881_v6 = vsel %vm2849_vm3, %v1865_v8, 0.0 }
 0x2b6   :  { %v1652_v32 = vpop.xlane.xlu1 %1651  ;;  %v1719_v28 = vsub.f32 1.5, %v1718_v63 }
 0x2b7   :  { %v2977_v15 = vadd.f32 1e-12, %v1652_v32  ;;  %v1970_v24 = vpop.eup %1969 }
 0x2b8   :  { %v1726_v4 = vmul.f32 %v1970_v24, %v1691_v55  ;;  %v1720_v23 = vmul.f32 %v1968_v41, %v1719_v28  ;;  %vm1732_vm12 = vweird.f32 %v1970_v24 }
 0x2b9   :  { %1971 = vrsqrt.f32 %v2977_v15  ;;  %vm1733_vm14 = vmor %vm1731_vm13, %vm1732_vm12  ;;  %vm1741_vm0 = vweird.f32 %v2977_v15 }
 0x2ba   :  { %v1727_v50 = vmul.f32 %v1970_v24, %v1726_v4  ;;  %1973 = vtanh.f32 %v2846_v60  ;;  %v1724_v47 = vsel %vm1723_vm10, %v1968_v41, %v1720_v23 }
 0x2bb   :  { %v1866_v37 = vmul.f32 %v1724_v47, %v2858_v42 }
 0x2bc   :  { %v1728_v17 = vmul.f32 0.5, %v1727_v50 }
 0x2bd   :  { %v1882_v13 = vsel %vm2849_vm3, %v1866_v37, 0.0 }
 0x2be   :  { %v1655_v29 = vpop.xlane.xlu2 %1654  ;;  %v1729_v40 = vsub.f32 1.5, %v1728_v17 }
 0x2bf   :  { %v2980_v44 = vadd.f32 1e-12, %v1655_v29  ;;  %v1972_v12 = vpop.eup %1971 }
 0x2c0   :  { %v1736_v35 = vmul.f32 %v1972_v12, %v2977_v15  ;;  %v1974_v49 = vpop.eup %1973  ;;  %v1730_v7 = vmul.f32 %v1970_v24, %v1729_v40  ;;  %vm1742_vm15 = vweird.f32 %v1972_v12 }
 0x2c1   :  { %1975 = vrsqrt.f32 %v2980_v44  ;;  %v1897_v25 = vsel %vm1588_vm11, %v1974_v49, %v1881_v6  ;;  %vm1743_vm1 = vmor %vm1741_vm0, %vm1742_vm15  ;;  %vm1751_vm4 = vweird.f32 %v2980_v44 }
 0x2c2   :  { %v1737_v33 = vmul.f32 %v1972_v12, %v1736_v35  ;;  %1977 = vtanh.f32 %v2858_v42  ;;  %v1734_v30 = vsel %vm1733_vm14, %v1970_v24, %v1730_v7 }
 0x2c3   :  { %v1867_v58 = vmul.f32 %v1734_v30, %v2866_v18 }
 0x2c4   :  { %v1738_v10 = vmul.f32 0.5, %v1737_v33 }
 0x2c5   :  { %v1883_v31 = vsel %vm2849_vm3, %v1867_v58, 0.0 }
 0x2c6   :  { %v1658_v61 = vpop.xlane.xlu2 %1657  ;;  %v1739_v9 = vsub.f32 1.5, %v1738_v10 }
 0x2c7   :  { %v2986_v62 = vadd.f32 1e-12, %v1658_v61  ;;  %v2991_v60 = vpop.eup %1975 }
 0x2c8   :  { %v1746_v43 = vmul.f32 %v2991_v60, %v2980_v44  ;;  %v1978_v19 = vpop.eup %1977  ;;  %v1740_v54 = vmul.f32 %v1972_v12, %v1739_v9  ;;  %vm1752_vm2 = vweird.f32 %v2991_v60 }
 0x2c9   :  { %1979 = vrsqrt.f32 %v2986_v62  ;;  %v1898_v20 = vsel %vm1588_vm11, %v1978_v19, %v1882_v13  ;;  %vm1753_vm5 = vmor %vm1751_vm4, %vm1752_vm2  ;;  %vm1761_vm7 = vweird.f32 %v2986_v62 }
 0x2ca   :  { %v1747_v22 = vmul.f32 %v2991_v60, %v1746_v43  ;;  %1981 = vtanh.f32 %v2866_v18  ;;  %v1744_v18 = vsel %vm1743_vm1, %v1972_v12, %v1740_v54 }
 0x2cb   :  { %v1868_v15 = vmul.f32 %v1744_v18, %v2874_v39 }
 0x2cc   :  { %v1748_v16 = vmul.f32 0.5, %v1747_v22 }
 0x2cd   :  { %1913 = vxpose.xlu1.b32.start [1/16] (narrow) %v1897_v25, 8  ;;  %v1884_v50 = vsel %vm2849_vm3, %v1868_v15, 0.0 }
 0x2ce   :  { %v1661_v14 = vpop.xlane.xlu0 %1660  ;;  %v1749_v32 = vsub.f32 1.5, %v1748_v16 }
 0x2cf   :  { %v3000_v36 = vadd.f32 1e-12, %v1661_v14  ;;  %v3005_v42 = vpop.eup %1979 }
 0x2d0   :  { %v1756_v55 = vmul.f32 %v3005_v42, %v2986_v62  ;;  %v1982_v46 = vpop.eup %1981  ;;  %v1750_v1 = vmul.f32 %v2991_v60, %v1749_v32  ;;  %vm1762_vm6 = vweird.f32 %v3005_v42 }
 0x2d1   :  { %1983 = vrsqrt.f32 %v3000_v36  ;;  %v1899_v24 = vsel %vm1588_vm11, %v1982_v46, %v1883_v31  ;;  %vm1763_vm8 = vmor %vm1761_vm7, %vm1762_vm6  ;;  %vm1771_vm10 = vweird.f32 %v3000_v36 }
 0x2d2   :  { %v1757_v0 = vmul.f32 %v3005_v42, %v1756_v55  ;;  %1985 = vtanh.f32 %v2874_v39  ;;  %v1754_v8 = vsel %vm1753_vm5, %v2991_v60, %v1750_v1 }
 0x2d3   :  { %v1869_v44 = vmul.f32 %v1754_v8, %v2882_v48 }
 0x2d4   :  { %v1758_v63 = vmul.f32 0.5, %v1757_v0 }
 0x2d5   :  { %1914 = vxpose.xlu1.b32.cont [2/16] (narrow) %v1898_v20, 8  ;;  %v1885_v33 = vsel %vm2849_vm3, %v1869_v44, 0.0 }
 0x2d6   :  { %v1664_v51 = vpop.xlane.xlu1 %1663  ;;  %v1759_v12 = vsub.f32 1.5, %v1758_v63 }
 0x2d7   :  { %v3015_v41 = vadd.f32 1e-12, %v1664_v51  ;;  %v3020_v2 = vpop.eup %1983 }
 0x2d8   :  { %v1766_v4 = vmul.f32 %v3020_v2, %v3000_v36  ;;  %v1986_v38 = vpop.eup %1985  ;;  %v1760_v35 = vmul.f32 %v3005_v42, %v1759_v12  ;;  %vm1772_vm9 = vweird.f32 %v3020_v2 }
 0x2d9   :  { %1987 = vrsqrt.f32 %v3015_v41  ;;  %v1900_v17 = vsel %vm1588_vm11, %v1986_v38, %v1884_v50  ;;  %vm1773_vm12 = vmor %vm1771_vm10, %vm1772_vm9  ;;  %vm1781_vm14 = vweird.f32 %v3015_v41 }
 0x2da   :  { %v1767_v39 = vmul.f32 %v3020_v2, %v1766_v4  ;;  %1989 = vtanh.f32 %v2882_v48  ;;  %v1764_v25 = vsel %vm1763_vm8, %v3005_v42, %v1760_v35 }
 0x2db   :  { %v1870_v62 = vmul.f32 %v1764_v25, %v2890_v21 }
 0x2dc   :  { %v1768_v61 = vmul.f32 0.5, %v1767_v39 }
 0x2dd   :  { %1915 = vxpose.xlu1.b32.cont [3/16] (narrow) %v1899_v24, 8  ;;  %v1886_v9 = vsel %vm2849_vm3, %v1870_v62, 0.0 }
 0x2de   :  { %v1667_v29 = vpop.xlane.xlu2 %1666  ;;  %v1769_v60 = vsub.f32 1.5, %v1768_v61 }
 0x2df   :  { %v3032_v28 = vadd.f32 1e-12, %v1667_v29  ;;  %v3038_v23 = vpop.eup %1987 }
 0x2e0   :  { %v1776_v6 = vmul.f32 %v3038_v23, %v3015_v41  ;;  %v1990_v47 = vpop.eup %1989  ;;  %v1770_v10 = vmul.f32 %v3020_v2, %v1769_v60  ;;  %vm1782_vm13 = vweird.f32 %v3038_v23 }
 0x2e1   :  { %1991 = vrsqrt.f32 %v3032_v28  ;;  %v1901_v7 = vsel %vm1588_vm11, %v1990_v47, %v1885_v33  ;;  %vm1783_vm15 = vmor %vm1781_vm14, %vm1782_vm13  ;;  %vm1791_vm1 = vweird.f32 %v3032_v28 }
 0x2e2   :  { %v1777_v48 = vmul.f32 %v3038_v23, %v1776_v6  ;;  %1993 = vtanh.f32 %v2890_v21  ;;  %v1774_v42 = vsel %vm1773_vm12, %v3020_v2, %v1770_v10 }
 0x2e3   :  { %v1871_v36 = vmul.f32 %v1774_v42, %v2898_v27 }
 0x2e4   :  { %v1778_v43 = vmul.f32 0.5, %v1777_v48 }
 0x2e5   :  { %1916 = vxpose.xlu1.b32.cont [4/16] (narrow) %v1900_v17, 8  ;;  %v1887_v46 = vsel %vm2849_vm3, %v1871_v36, 0.0 }
 0x2e6   :  { %v1670_v49 = vpop.xlane.xlu0 %1669  ;;  %v1779_v30 = vsub.f32 1.5, %v1778_v43 }
 0x2e7   :  { %v3050_v40 = vadd.f32 1e-12, %v1670_v49  ;;  %v3056_v37 = vpop.eup %1991 }
 0x2e8   :  { %v1786_v14 = vmul.f32 %v3056_v37, %v3032_v28  ;;  %v1994_v22 = vpop.eup %1993  ;;  %v1780_v54 = vmul.f32 %v3038_v23, %v1779_v30  ;;  %vm1792_vm0 = vweird.f32 %v3056_v37 }
 0x2e9   :  { %1995 = vrsqrt.f32 %v3050_v40  ;;  %v1902_v58 = vsel %vm1588_vm11, %v1994_v22, %v1886_v9  ;;  %vm1793_vm2 = vmor %vm1791_vm1, %vm1792_vm0  ;;  %vm1801_vm5 = vweird.f32 %v3050_v40 }
 0x2ea   :  { %v1787_v21 = vmul.f32 %v3056_v37, %v1786_v14  ;;  %1997 = vtanh.f32 %v2898_v27  ;;  %v1784_v18 = vsel %vm1783_vm15, %v3038_v23, %v1780_v54 }
 0x2eb   :  { %v1872_v41 = vmul.f32 %v1784_v18, %v2906_v53 }
 0x2ec   :  { %v1788_v16 = vmul.f32 0.5, %v1787_v21 }
 0x2ed   :  { %1917 = vxpose.xlu1.b32.cont [5/16] (narrow) %v1901_v7, 8  ;;  %v1888_v50 = vsel %vm2849_vm3, %v1872_v41, 0.0 }
 0x2ee   :  { %v1673_v13 = vpop.xlane.xlu1 %1672  ;;  %v1789_v0 = vsub.f32 1.5, %v1788_v16 }
 0x2ef   :  { %v3068_v19 = vadd.f32 1e-12, %v1673_v13  ;;  %v3074_v20 = vpop.eup %1995 }
 0x2f0   :  { %v1796_v55 = vmul.f32 %v3074_v20, %v3050_v40  ;;  %v1998_v32 = vpop.eup %1997  ;;  %v1790_v15 = vmul.f32 %v3056_v37, %v1789_v0  ;;  %vm1802_vm4 = vweird.f32 %v3074_v20 }
 0x2f1   :  { %1999 = vrsqrt.f32 %v3068_v19  ;;  %v1903_v24 = vsel %vm1588_vm11, %v1998_v32, %v1887_v46  ;;  %vm1803_vm6 = vmor %vm1801_vm5, %vm1802_vm4  ;;  %vm1811_vm8 = vweird.f32 %v3068_v19 }
 0x2f2   :  { %v1797_v27 = vmul.f32 %v3074_v20, %v1796_v55  ;;  %2001 = vtanh.f32 %v2906_v53  ;;  %v1794_v39 = vsel %vm1793_vm2, %v3056_v37, %v1790_v15 }
 0x2f3   :  { %v1873_v28 = vmul.f32 %v1794_v39, %v2914_v34 }
 0x2f4   :  { %v1798_v1 = vmul.f32 0.5, %v1797_v27 }
 0x2f5   :  { %1918 = vxpose.xlu1.b32.cont [6/16] (narrow) %v1902_v58, 8  ;;  %v1889_v49 = vsel %vm2849_vm3, %v1873_v28, 0.0 }
 0x2f6   :  { %v1676_v51 = vpop.xlane.xlu2 %1675  ;;  %v1799_v12 = vsub.f32 1.5, %v1798_v1 }
 0x2f7   :  { %v3086_v31 = vadd.f32 1e-12, %v1676_v51  ;;  %v3092_v2 = vpop.eup %1999 }
 0x2f8   :  { %v1806_v63 = vmul.f32 %v3092_v2, %v3068_v19  ;;  %v2002_v38 = vpop.eup %2001  ;;  %v1800_v17 = vmul.f32 %v3074_v20, %v1799_v12  ;;  %vm1812_vm7 = vweird.f32 %v3092_v2 }
 0x2f9   :  { %2003 = vrsqrt.f32 %v3086_v31  ;;  %v1904_v23 = vsel %vm1588_vm11, %v2002_v38, %v1888_v50  ;;  %vm1813_vm9 = vmor %vm1811_vm8, %vm1812_vm7  ;;  %vm1821_vm12 = vweird.f32 %v3086_v31 }
 0x2fa   :  { %v1807_v53 = vmul.f32 %v3092_v2, %v1806_v63  ;;  %2005 = vtanh.f32 %v2914_v34  ;;  %v1804_v60 = vsel %vm1803_vm6, %v3074_v20, %v1800_v17 }
 0x2fb   :  { %v1874_v40 = vmul.f32 %v1804_v60, %v2922_v56 }
 0x2fc   :  { %v1808_v44 = vmul.f32 0.5, %v1807_v53 }
 0x2fd   :  { %1919 = vxpose.xlu1.b32.cont [7/16] (narrow) %v1903_v24, 8  ;;  %v1890_v14 = vsel %vm2849_vm3, %v1874_v40, 0.0 }
 0x2fe   :  { %v1679_v4 = vpop.xlane.xlu0 %1678  ;;  %v1809_v47 = vsub.f32 1.5, %v1808_v44 }
 0x2ff   :  { %v3104_v29 = vadd.f32 1e-12, %v1679_v4  ;;  %v3110_v8 = vpop.eup %2003 }
 0x300   :  { %v1816_v35 = vmul.f32 %v3110_v8, %v3086_v31  ;;  %v2006_v33 = vpop.eup %2005  ;;  %v1810_v37 = vmul.f32 %v3092_v2, %v1809_v47  ;;  %vm1822_vm10 = vweird.f32 %v3110_v8 }
 0x301   :  { %2007 = vrsqrt.f32 %v3104_v29  ;;  %v1905_v25 = vsel %vm1588_vm11, %v2006_v33, %v1889_v49  ;;  %vm1823_vm13 = vmor %vm1821_vm12, %vm1822_vm10  ;;  %vm1831_vm15 = vweird.f32 %v3104_v29 }
 0x302   :  { %v1817_v34 = vmul.f32 %v3110_v8, %v1816_v35  ;;  %2009 = vtanh.f32 %v2922_v56  ;;  %v1814_v56 = vsel %vm1813_vm9, %v3092_v2, %v1810_v37 }
 0x303   :  { %v1875_v19 = vmul.f32 %v1814_v56, %v2930_v26 }
 0x304   :  { %v1818_v7 = vmul.f32 0.5, %v1817_v34 }
 0x305   :  { %1920 = vxpose.xlu1.b32.cont [8/16] (narrow) %v1904_v23, 8  ;;  %v1891_v16 = vsel %vm2849_vm3, %v1875_v19, 0.0 }
 0x306   :  { %v1682_v61 = vpop.xlane.xlu1 %1681  ;;  %v1819_v9 = vsub.f32 1.5, %v1818_v7 }
 0x307   :  { %v3122_v6 = vadd.f32 1e-12, %v1682_v61  ;;  %v2008_v48 = vpop.eup %2007 }
 0x308   :  { %v1826_v62 = vmul.f32 %v2008_v48, %v3104_v29  ;;  %v2010_v13 = vpop.eup %2009  ;;  %v1820_v42 = vmul.f32 %v3110_v8, %v1819_v9  ;;  %vm1832_vm14 = vweird.f32 %v2008_v48 }
 0x309   :  { %2011 = vrsqrt.f32 %v3122_v6  ;;  %v1906_v21 = vsel %vm1588_vm11, %v2010_v13, %v1890_v14  ;;  %vm1833_vm0 = vmor %vm1831_vm15, %vm1832_vm14  ;;  %vm1841_vm2 = vweird.f32 %v3122_v6 }
 0x30a   :  { %v1827_v22 = vmul.f32 %v2008_v48, %v1826_v62  ;;  %2013 = vtanh.f32 %v2930_v26  ;;  %v1824_v26 = vsel %vm1823_vm13, %v3110_v8, %v1820_v42 }
 0x30b   :  { %v1876_v31 = vmul.f32 %v1824_v26, %v2938_v3 }
 0x30c   :  { %v1828_v20 = vmul.f32 0.5, %v1827_v22 }
 0x30d   :  { %1921 = vxpose.xlu1.b32.cont [9/16] (narrow) %v1905_v25, 8  ;;  %v1892_v24 = vsel %vm2849_vm3, %v1876_v31, 0.0 }
 0x30e   :  { %v1685_v10 = vpop.xlane.xlu2 %1684  ;;  %v1829_v51 = vsub.f32 1.5, %v1828_v20 }
 0x30f   :  { %v3137_v43 = vadd.f32 1e-12, %v1685_v10  ;;  %v2012_v30 = vpop.eup %2011 }
 0x310   :  { %v1836_v58 = vmul.f32 %v2012_v30, %v3122_v6  ;;  %v2014_v55 = vpop.eup %2013  ;;  %v1830_v27 = vmul.f32 %v2008_v48, %v1829_v51  ;;  %vm1842_vm1 = vweird.f32 %v2012_v30 }
 0x311   :  { %2015 = vrsqrt.f32 %v3137_v43  ;;  %v1907_v0 = vsel %vm1588_vm11, %v2014_v55, %v1891_v16  ;;  %vm1843_vm4 = vmor %vm1841_vm2, %vm1842_vm1  ;;  %vm1851_vm6 = vweird.f32 %v3137_v43 }
 0x312   :  { %v1837_v46 = vmul.f32 %v2012_v30, %v1836_v58  ;;  %2017 = vtanh.f32 %v2938_v3  ;;  %v1834_v63 = vsel %vm1833_vm0, %v2008_v48, %v1830_v27 }
 0x313   :  { %v1877_v3 = vmul.f32 %v1834_v63, %v2946_v45 }
 0x314   :  { %v1838_v18 = vmul.f32 0.5, %v1837_v46 }
 0x315   :  { %1922 = vxpose.xlu1.b32.cont [10/16] (narrow) %v1906_v21, 8  ;;  %v1893_v53 = vsel %vm2849_vm3, %v1877_v3, 0.0 }
 0x316   :  { %v1688_v36 = vpop.xlane.xlu0 %1687  ;;  %v1839_v15 = vsub.f32 1.5, %v1838_v18 }
 0x317   :  { %v1704_v54 = vadd.f32 1e-12, %v1688_v36  ;;  %v2016_v32 = vpop.eup %2015 }
 0x318   :  { %v1846_v2 = vmul.f32 %v2016_v32, %v3137_v43  ;;  %v2018_v41 = vpop.eup %2017  ;;  %v1840_v38 = vmul.f32 %v2012_v30, %v1839_v15  ;;  %vm1852_vm5 = vweird.f32 %v2016_v32 }
 0x319   :  { %2019 = vrsqrt.f32 %v1704_v54  ;;  %v1908_v50 = vsel %vm1588_vm11, %v2018_v41, %v1892_v24  ;;  %vm1853_vm7 = vmor %vm1851_vm6, %vm1852_vm5  ;;  %vm1861_vm9 = vweird.f32 %v1704_v54 }
 0x31a   :  { %v1847_v1 = vmul.f32 %v2016_v32, %v1846_v2  ;;  %2021 = vtanh.f32 %v2946_v45  ;;  %v1844_v23 = vsel %vm1843_vm4, %v2012_v30, %v1840_v38 }
 0x31b   :  { %2023 = vtanh.f32 %v2954_v59  ;;  %v1878_v45 = vmul.f32 %v1844_v23, %v2954_v59 }
 0x31c   :  { %v1848_v29 = vmul.f32 0.5, %v1847_v1  ;;  %2025 = vtanh.f32 %v2962_v52 }
 0x31d   :  { %1923 = vxpose.xlu1.b32.cont [11/16] (narrow) %v1907_v0, 8  ;;  %v1894_v61 = vsel %vm2849_vm3, %v1878_v45, 0.0  ;;  %2027 = vtanh.f32 %v2970_v5 }
 0x31e   :  { %v1849_v39 = vsub.f32 1.5, %v1848_v29 }
 0x31f   :  { %v2020_v4 = vpop.eup %2019 }
 0x320   :  { %v1856_v12 = vmul.f32 %v2020_v4, %v1704_v54  ;;  %v2022_v28 = vpop.eup %2021  ;;  %v1850_v44 = vmul.f32 %v2016_v32, %v1849_v39  ;;  %vm1862_vm8 = vweird.f32 %v2020_v4 }
 0x321   :  { %v1909_v17 = vsel %vm1588_vm11, %v2022_v28, %v1893_v53  ;;  %v2024_v33 = vpop.eup %2023  ;;  %vm1863_vm10 = vmor %vm1861_vm9, %vm1862_vm8 }
 0x322   :  { %v1857_v8 = vmul.f32 %v2020_v4, %v1856_v12  ;;  %v1854_v49 = vsel %vm1853_vm7, %v2016_v32, %v1850_v44  ;;  %v1910_v47 = vsel %vm1588_vm11, %v2024_v33, %v1894_v61  ;;  %v2026_v25 = vpop.eup %2025 }
 0x323   :  { %v1879_v59 = vmul.f32 %v1854_v49, %v2962_v52  ;;  %v2028_v7 = vpop.eup %2027 }
 0x324   :  { %v1858_v35 = vmul.f32 0.5, %v1857_v8 }
 0x325   :  { %1924 = vxpose.xlu1.b32.cont [12/16] (narrow) %v1908_v50, 8  ;;  %v1895_v60 = vsel %vm2849_vm3, %v1879_v59, 0.0 }
 0x326   :  { %v1859_v6 = vsub.f32 1.5, %v1858_v35  ;;  %v1911_v40 = vsel %vm1588_vm11, %v2026_v25, %v1895_v60 }
 0x328   :  { %v1860_v34 = vmul.f32 %v2020_v4, %v1859_v6 }
 0x32a   :  { %v1864_v48 = vsel %vm1863_vm10, %v2020_v4, %v1860_v34 }
 0x32b   :  { %v1880_v37 = vmul.f32 %v1864_v48, %v2970_v5 }
 0x32d   :  { %1925 = vxpose.xlu1.b32.cont [13/16] (narrow) %v1909_v17, 8  ;;  %v1896_v52 = vsel %vm2849_vm3, %v1880_v37, 0.0 }
 0x32e   :  { %v1912_v62 = vsel %vm1588_vm11, %v2028_v7, %v1896_v52 }
 0x335   :  { %1926 = vxpose.xlu1.b32.cont [14/16] (narrow) %v1910_v47, 8 }
 0x33d   :  { %1927 = vxpose.xlu1.b32.cont [15/16] (narrow) %v1911_v40, 8 }
 0x345   :  { %1928 = vxpose.xlu1.b32.end [16/16] (narrow) %v1912_v62, 8 }
 0x371   :  { %v1929_v10 = vpop.trf.xlu1 }
 0x372   :  { %1945 = vst [vmem:[#allocation2] sm:$0xff] %v1929_v10 }
 0x373   :  { %1956 = dma.vmem_to_hbm [thread:$0]  %s1952_s12, 128, %s1954_s15, [#allocation3]  }
 0x374   :  { %2053 = dma.done.wait [#allocation3], 128  }
 0x375   :  { %2054 = vsyncadd [#allocation3], 4294967168 }
 0x376   :  { %1961 = vsyncpa [#allocation3], 1 }

</bundles_post_ra>
